<compile_context>
chip_gen: v7x
topology: tpu7x:2x2x1
jax: 0.10.0
libtpu: 0.0.40
codegen_flags: <defaults>
</compile_context>

<pallas_src>
import functools

import jax
import jax.numpy as jnp
from jax import lax
from jax.experimental import pallas as pl
from jax.experimental.pallas import tpu as pltpu


# ------------------------------- main kernel -------------------------------- #
def _supcon_tile_kernel(
    z_rows_ref, zm_rows_ref, s_rows_ref, f_rows_ref,      # (TILE_M, D) bf16 row tiles
    rp_col_ref, rpe_col_ref,                               # (TILE_M, 1) f32
    zT_ref, zmT_ref, sT_ref, fT_ref,                       # (D, BATCH_P) bf16, grid-invariant
    rp_row_ref, rpe_row_ref,                               # (1, BATCH_P) f32, grid-invariant
    negl_ref,                                              # (TILE_M, BATCH_P) int8, grid-invariant
    out_ref,                                               # (8, 128) f32 partial-loss block
    *, split, tile_m, batch, batch_p, rows_padded,
    temperature, base_temperature, lmbd, reweighting,
):
    num_groups = tile_m // split          # mini-iters fused into this row tile
    inv_t = 1.0 / temperature
    scale = temperature / base_temperature
    f32 = jnp.float32
    row0 = pl.program_id(0) * tile_m

    # Negative mask (boolean): off the global diagonal, real contrast column,
    # real anchor row.  Column/row padding guards are compile-time optional.
    col_g = lax.broadcasted_iota(jnp.int32, (tile_m, batch_p), 1)
    row_l = lax.broadcasted_iota(jnp.int32, (tile_m, batch_p), 0)
    negb = (col_g - row_l) != row0
    if batch_p > batch:
        negb = jnp.logical_and(negb, col_g < batch)
    if rows_padded:
        negb = jnp.logical_and(negb, (row_l + row0) < batch)

    # ---- boolean positive / neglect masks (bf16 MXU dots, f32 accumulate) ----
    cos_f = jnp.dot(f_rows_ref[...], fT_ref[...], preferred_element_type=f32)
    mask_one_b = jnp.logical_and(
        jnp.logical_or(rp_col_ref[...] < cos_f, rp_row_ref[...] < cos_f), negb)
    nnm_b = jnp.logical_or(mask_one_b,
                           jnp.logical_and(negl_ref[...] != 0, negb))

    cos_s = jnp.dot(s_rows_ref[...], sT_ref[...], preferred_element_type=f32)
    mask_ema_b = jnp.logical_and(
        jnp.logical_or(rpe_col_ref[...] < cos_s, rpe_row_ref[...] < cos_s), negb)

    # ---- masked log-softmax; normalizer folded into the row reductions ----
    def shifted_and_logdenom(rows_ref, colsT_ref):
        logits = jnp.dot(rows_ref[...], colsT_ref[...],
                         preferred_element_type=f32) * inv_t
        sh = logits - jnp.max(logits, axis=1, keepdims=True)
        denom = jnp.sum(jnp.where(nnm_b, jnp.exp(sh), 0.0), axis=1, keepdims=True)
        return sh, jnp.log(jnp.maximum(denom, 1e-37))

    sh_z, logden_z = shifted_and_logdenom(z_rows_ref, zT_ref)
    sh_m, logden_m = shifted_and_logdenom(zm_rows_ref, zmT_ref)

    # ---- per-row reductions ----
    mask_one_f = jnp.where(mask_one_b, 1.0, 0.0).astype(f32)
    weighted = mask_one_f + jnp.where(mask_ema_b, jnp.float32(lmbd), 0.0)

    row_pos = jnp.sum(mask_one_f, axis=1, keepdims=True)       # (TILE_M, 1)
    w_sum = jnp.sum(weighted, axis=1, keepdims=True)
    # sum(w*lp_z) + sum(w*lp_zmix) == sum(w*(sh_z+sh_m)) - w_sum*(logden_z+logden_m)
    dot_sum = (jnp.sum(weighted * (sh_z + sh_m), axis=1, keepdims=True)
               - w_sum * (logden_z + logden_m))
    valid = row_pos > 0.0                                       # nonzero_idx as a mask

    # one-hot mini-iter (group) matrix: gmat[r, g] = 1 iff local row r is in group g
    if num_groups == 1:
        gmat = jnp.ones((tile_m, 1), f32)
    else:
        r_idx = lax.broadcasted_iota(jnp.int32, (tile_m, num_groups), 0)
        g_idx = lax.broadcasted_iota(jnp.int32, (tile_m, num_groups), 1)
        gmat = jnp.logical_and(r_idx >= g_idx * split,
                               r_idx < (g_idx + 1) * split).astype(f32)

    if reweighting:
        # pnm normalization cancels 1/n_sel algebraically:
        #   term_g = sum_valid(dot_sum) / sum_valid(w_sum)
        num = jnp.sum(jnp.where(valid, dot_sum, 0.0) * gmat, axis=0, keepdims=True)
        den = jnp.sum(jnp.where(valid, w_sum, 0.0) * gmat, axis=0, keepdims=True)
        ok = den > 0.0
        terms = jnp.where(ok, num / jnp.where(ok, den, 1.0), 0.0)     # (1, G)
    else:
        safe_w = jnp.where(valid, w_sum, 1.0)
        mlp = jnp.where(valid, dot_sum / safe_w, 0.0)
        n_sel = jnp.sum(jnp.where(valid, 1.0, 0.0) * gmat, axis=0, keepdims=True)
        s1 = jnp.sum(mlp * gmat, axis=0, keepdims=True)
        ok = n_sel > 0.0
        terms = jnp.where(ok, s1 / jnp.where(ok, n_sel, 1.0), 0.0)

    tile_loss = -scale * jnp.sum(terms, axis=1, keepdims=True)   # (1, 1)
    # lane-dense, fully aligned (8,128) store of this tile's partial loss
    out_ref[...] = tile_loss + jnp.zeros((8, 128), f32)


# --------------------------------- helpers ----------------------------------- #
def _choose_tile_m(batch, split, target=256):
    """Largest tile (multiple of split, <= target) preferring >= 2 grid tiles
    (v7x megacore) and a divisor of batch (no row padding)."""
    if batch <= split:
        return split
    cap = min(target, max(split, batch // 2))
    cap = max((cap // split) * split, split)
    best = None
    for t in range(cap, split - 1, -split):
        if batch % t == 0:
            best = t
            break
    if best is not None and 2 * best >= cap:
        return best
    return cap          # no friendly divisor: pad the anchor rows up to a tile multiple


def _vmem_estimate(tile_m, d, batch_p):
    resident = 4 * d * batch_p * 2 + tile_m * batch_p + 2 * batch_p * 4
    row_bufs = 2 * (4 * tile_m * d * 2 + 2 * tile_m * 4)
    f32_temps = 10 * tile_m * batch_p * 4
    return 2 * resident + row_bufs + f32_temps + (2 << 20)


# --------------------------------- wrapper ----------------------------------- #
def supcon_loss(z, s_pr, f, pool_ag, pool_sp, z_mix, mask_neglect_base, *,
                spatial_size, temperature=0.07, base_temperature=0.07,
                lmbd=0.5, reweighting=True, tile_m=None):
    batch, d = z.shape
    split = spatial_size * spatial_size
    assert batch % split == 0, "batch must be mini_iters * spatial_size**2"
    mini_iters = batch // split

    batch_p = ((batch + 127) // 128) * 128          # lane-dense contrast axis

    # Physical VMEM (v5e/v6e: 128 MiB, v7x: 64 MiB); keep 1/8 headroom for the compiler.
    try:
        phys = int(pltpu.get_tpu_info().vmem_capacity_bytes)
    except Exception:
        phys = 64 * 1024 * 1024
    budget = (phys * 7) // 8

    if tile_m is None:
        target = 256
        tile_m = _choose_tile_m(batch, split, target)
        while _vmem_estimate(tile_m, d, batch_p) > budget and tile_m > split:
            target = max(split, target // 2)
            tile_m = _choose_tile_m(batch, split, target)
    assert tile_m % split == 0 and tile_m >= split

    num_tiles = pl.cdiv(batch, tile_m)
    rows_p = num_tiles * tile_m                     # anchor rows padded to a tile multiple
    groups_per_tile = tile_m // split

    bf16, f32 = jnp.bfloat16, jnp.float32
    zb, zmb, sb, fb = (t.astype(bf16) for t in (z, z_mix, s_pr, f))

    # Rpoint pre-pass: tiny (batch,D)@(D,P) + row-max -> plain JAX (bf16 operands,
    # f32 accumulation, matching the fp16-autocast matmul of the PyTorch code).
    rp = jnp.max(jnp.dot(fb, pool_ag.astype(bf16).T, preferred_element_type=f32), axis=1)
    rpe = jnp.max(jnp.dot(sb, pool_sp.astype(bf16).T, preferred_element_type=f32), axis=1)

    def pad_rows(x):
        return x if rows_p == batch else jnp.pad(x, ((0, rows_p - batch), (0, 0)))

    def pad_cols(x, value=0):
        if batch_p == batch:
            return x
        return jnp.pad(x, ((0, 0), (0, batch_p - batch)), constant_values=value)

    # anchor-side row tiles (possibly row-padded; padded rows are masked invalid in-kernel)
    z_rows, zm_rows, s_rows, f_rows = (pad_rows(t) for t in (zb, zmb, sb, fb))
    rp_col = pad_rows(rp.reshape(batch, 1))
    rpe_col = pad_rows(rpe.reshape(batch, 1))

    # contrast-side operands: transposed ONCE here, lane-padded to batch_p (padded
    # columns are excluded through the negative mask; pad values are irrelevant)
    zT, zmT, sT, fT = (pad_cols(t.T) for t in (zb, zmb, sb, fb))
    rp_row = pad_cols(rp.reshape(1, batch), 1e30)
    rpe_row = pad_cols(rpe.reshape(1, batch), 1e30)

    # neglect base repeats every `split` anchor rows -> one resident (TILE_M, BATCH_P) int8
    negl = jnp.tile((mask_neglect_base > 0.5).astype(jnp.int8), (groups_per_tile, 1))
    negl = pad_cols(negl)

    kernel = functools.partial(
        _supcon_tile_kernel,
        split=split, tile_m=tile_m, batch=batch, batch_p=batch_p,
        rows_padded=bool(rows_p > batch),
        temperature=float(temperature), base_temperature=float(base_temperature),
        lmbd=float(lmbd), reweighting=bool(reweighting))

    vmem_limit = int(min(max(_vmem_estimate(tile_m, d, batch_p), 16 * 1024 * 1024), budget))

    operands = (z_rows, zm_rows, s_rows, f_rows, rp_col, rpe_col,
                zT, zmT, sT, fT, rp_row, rpe_row, negl)

    def call(use_buffered):
        def row_spec(shape):
            return pl.BlockSpec(shape, lambda i: (i, 0))

        def resident_spec(shape):
            if use_buffered:   # grid-invariant -> single buffer is enough
                return pl.BlockSpec(shape, lambda i: (0, 0), pipeline_mode=pl.Buffered(1))
            return pl.BlockSpec(shape, lambda i: (0, 0))

        in_specs = [
            row_spec((tile_m, d)), row_spec((tile_m, d)),
            row_spec((tile_m, d)), row_spec((tile_m, d)),
            row_spec((tile_m, 1)), row_spec((tile_m, 1)),
            resident_spec((d, batch_p)), resident_spec((d, batch_p)),
            resident_spec((d, batch_p)), resident_spec((d, batch_p)),
            resident_spec((1, batch_p)), resident_spec((1, batch_p)),
            resident_spec((tile_m, batch_p)),
        ]
        return pl.pallas_call(
            kernel,
            out_shape=jax.ShapeDtypeStruct((num_tiles * 8, 128), jnp.float32),
            grid=(num_tiles,),
            in_specs=in_specs,
            out_specs=pl.BlockSpec((8, 128), lambda i: (i, 0)),
            compiler_params=pltpu.CompilerParams(
                dimension_semantics=("parallel",),
                vmem_limit_bytes=vmem_limit),
        )(*operands)

    try:
        partials = call(True)
    except Exception:              # pipeline_mode=Buffered(1) unsupported -> default buffering
        partials = call(False)

    loss = jnp.sum(partials.reshape(num_tiles, 8, 128)[:, 0, 0])
    return (loss / mini_iters) / 2.0


# --------------------------- pure-JAX reference ------------------------------ #
# Faithful transcription of the PyTorch loop (loss_version=1).  Matmul operands
# are bf16 with f32 accumulation, mirroring the fp16 autocast of the original
# module and the kernel above.
def supcon_loss_ref(z, s_pr, f, pool_ag, pool_sp, z_mix, mask_neglect_base, *,
                    spatial_size, temperature=0.07, base_temperature=0.07,
                    lmbd=0.5, reweighting=True):
    batch = z.shape[0]
    split = spatial_size * spatial_size
    mini_iters = batch // split
    bf16, f32 = jnp.bfloat16, jnp.float32
    zb, zmb, sb, fb = (t.astype(bf16) for t in (z, z_mix, s_pr, f))
    rpoint = jnp.max(jnp.dot(fb, pool_ag.astype(bf16).T, preferred_element_type=f32), axis=1)
    rpoint_ema = jnp.max(jnp.dot(sb, pool_sp.astype(bf16).T, preferred_element_type=f32), axis=1)
    neg_mask = 1.0 - jnp.eye(split, batch)
    loss = 0.0
    scale = temperature / base_temperature
    for mi in range(mini_iters):
        sl = slice(mi * split, (mi + 1) * split)
        cos_f = jnp.dot(fb[sl], fb.T, preferred_element_type=f32)
        mask_one = jnp.logical_or(rpoint[sl][:, None] < cos_f, rpoint[None, :] < cos_f)
        neglect = jnp.logical_or(mask_one, mask_neglect_base > 0.5).astype(f32)
        nnm = neg_mask * neglect
        mask_one = mask_one.astype(f32) * neg_mask
        cos_s = jnp.dot(sb[sl], sb.T, preferred_element_type=f32)
        mask_ema = jnp.logical_or(
            rpoint_ema[sl][:, None] < cos_s, rpoint_ema[None, :] < cos_s
        ).astype(f32) * neg_mask

        def lp_of(xb):
            logits = jnp.dot(xb[sl], xb.T, preferred_element_type=f32) / temperature
            logits = logits - jnp.max(logits, axis=1, keepdims=True)
            return logits - jnp.log(jnp.sum(jnp.exp(logits) * nnm, axis=1, keepdims=True))

        lp, lpm = lp_of(zb), lp_of(zmb)
        idx = jnp.where(jnp.sum(mask_one, axis=1) != 0.0)[0]
        m, me_ = mask_one[idx], mask_ema[idx]
        lp_s, lpm_s = lp[idx], lpm[idx]
        wm = m + me_ * lmbd
        if reweighting:
            pnm = jnp.sum(wm, axis=1)
            pnm = pnm / jnp.sum(pnm)
            pnm = pnm / jnp.mean(pnm)
        else:
            pnm = 1.0
        loss = loss - jnp.mean(scale * (jnp.sum(wm * lp_s, axis=1) / jnp.sum(wm, axis=1)) * pnm)
        loss = loss - jnp.mean(scale * (jnp.sum(wm * lpm_s, axis=1) / jnp.sum(wm, axis=1)) * pnm)
        neg_mask = jnp.roll(neg_mask, split, axis=1)
    return loss / mini_iters / 2.0


if __name__ == "__main__":
    key = jax.random.PRNGKey(0)
    spatial_size = 4
    split = spatial_size * spatial_size          # 16
    mini_iters = 2
    batch = split * mini_iters                   # 32
    D = 128
    P_AG, P_SP = 8, 8
    rho = 0.3
    lmbd = 0.5

    ks = jax.random.split(key, 8)

    def clustered_unit(k, n, d, n_clusters=4, noise=0.3):
        k1, k2 = jax.random.split(k)
        centers = jax.random.normal(k1, (n_clusters, d), dtype=jnp.float32)
        assign = jnp.arange(n) % n_clusters
        x = centers[assign] + noise * jax.random.normal(k2, (n, d), dtype=jnp.float32)
        return x / jnp.linalg.norm(x, axis=-1, keepdims=True)

    def unit(k, shape):
        x = jax.random.normal(k, shape, dtype=jnp.float32)
        return x / jnp.linalg.norm(x, axis=-1, keepdims=True)

    z = clustered_unit(ks[0], batch, D)
    z_mix = clustered_unit(ks[1], batch, D)
    s_pr = clustered_unit(ks[2], batch, D)
    f = clustered_unit(ks[3], batch, D)
    pool_ag = unit(ks[4], (P_AG, D))
    pool_sp = unit(ks[5], (P_SP, D))
    # uniform(split, batch) < rho (float 0/1 mask; deterministic stand-in for torch RNG)
    mask_neglect_base = (jax.random.uniform(ks[6], (split, batch)) < rho).astype(jnp.float32)

    loss = supcon_loss(z, s_pr, f, pool_ag, pool_sp, z_mix, mask_neglect_base,
                       spatial_size=spatial_size, lmbd=lmbd)
    loss = jax.block_until_ready(loss)

    loss_ref = supcon_loss_ref(z, s_pr, f, pool_ag, pool_sp, z_mix, mask_neglect_base,
                               spatial_size=spatial_size, lmbd=lmbd)
    assert jnp.allclose(loss, loss_ref, rtol=2e-3, atol=2e-3), (loss, loss_ref)
    print("KERNEL_OK")
</pallas_src>

<mosaic_0001>
module attributes {stable_mosaic.version = 11 : i64} {
  func.func @_supcon_tile_kernel(%arg0: i32, %arg1: memref<16x128xbf16, #tpu.memory_space<vmem>>, %arg2: memref<16x128xbf16, #tpu.memory_space<vmem>>, %arg3: memref<16x128xbf16, #tpu.memory_space<vmem>>, %arg4: memref<16x128xbf16, #tpu.memory_space<vmem>>, %arg5: memref<16x1xf32, #tpu.memory_space<vmem>>, %arg6: memref<16x1xf32, #tpu.memory_space<vmem>>, %arg7: memref<128x128xbf16, #tpu.memory_space<vmem>>, %arg8: memref<128x128xbf16, #tpu.memory_space<vmem>>, %arg9: memref<128x128xbf16, #tpu.memory_space<vmem>>, %arg10: memref<128x128xbf16, #tpu.memory_space<vmem>>, %arg11: memref<1x128xf32, #tpu.memory_space<vmem>>, %arg12: memref<1x128xf32, #tpu.memory_space<vmem>>, %arg13: memref<16x128xi8, #tpu.memory_space<vmem>>, %arg14: memref<8x128xf32, #tpu.memory_space<vmem>>) attributes {dimension_semantics = [#tpu.dimension_semantics<parallel>], iteration_bounds = array<i64: 2>, scalar_prefetch = 0 : i64, scratch_operands = 0 : i64, tpu.core_type = #tpu.core_type<tc>, window_params = [{transform_indices = @transform_0, window_bounds = array<i64: 16, 128>}, {transform_indices = @transform_1, window_bounds = array<i64: 16, 128>}, {transform_indices = @transform_2, window_bounds = array<i64: 16, 128>}, {transform_indices = @transform_3, window_bounds = array<i64: 16, 128>}, {transform_indices = @transform_4, window_bounds = array<i64: 16, 1>}, {transform_indices = @transform_5, window_bounds = array<i64: 16, 1>}, {pipeline_mode = #tpu.pipeline_mode<synchronous>, transform_indices = @transform_6, window_bounds = array<i64: 128, 128>}, {pipeline_mode = #tpu.pipeline_mode<synchronous>, transform_indices = @transform_7, window_bounds = array<i64: 128, 128>}, {pipeline_mode = #tpu.pipeline_mode<synchronous>, transform_indices = @transform_8, window_bounds = array<i64: 128, 128>}, {pipeline_mode = #tpu.pipeline_mode<synchronous>, transform_indices = @transform_9, window_bounds = array<i64: 128, 128>}, {pipeline_mode = #tpu.pipeline_mode<synchronous>, transform_indices = @transform_10, window_bounds = array<i64: 1, 128>}, {pipeline_mode = #tpu.pipeline_mode<synchronous>, transform_indices = @transform_11, window_bounds = array<i64: 1, 128>}, {pipeline_mode = #tpu.pipeline_mode<synchronous>, transform_indices = @transform_12, window_bounds = array<i64: 16, 128>}, {transform_indices = @transform_13, window_bounds = array<i64: 8, 128>}]} {
    %c16_i32 = arith.constant 16 : i32
    %0 = arith.muli %arg0, %c16_i32 : i32
    %1 = tpu.iota {dimensions = array<i32: 1>} : vector<16x128xi32>
    %2 = tpu.iota {dimensions = array<i32: 0>} : vector<16x128xi32>
    %3 = arith.subi %1, %2 : vector<16x128xi32>
    %4 = vector.broadcast %0 : i32 to vector<16x128xi32>
    %5 = arith.cmpi ne, %3, %4 : vector<16x128xi32>
    %c32_i32 = arith.constant 32 : i32
    %6 = vector.broadcast %c32_i32 : i32 to vector<16x128xi32>
    %7 = arith.cmpi slt, %1, %6 : vector<16x128xi32>
    %8 = arith.andi %5, %7 : vector<16x128xi1>
    %c0 = arith.constant 0 : index
    %c0_0 = arith.constant 0 : index
    %9 = vector.load %arg4[%c0, %c0_0] : memref<16x128xbf16, #tpu.memory_space<vmem>>, vector<16x128xbf16>
    %c0_1 = arith.constant 0 : index
    %c0_2 = arith.constant 0 : index
    %10 = vector.load %arg10[%c0_1, %c0_2] : memref<128x128xbf16, #tpu.memory_space<vmem>>, vector<128x128xbf16>
    %cst = arith.constant dense<0.000000e+00> : vector<16x128xf32>
    %11 = tpu.matmul %9, %10, %cst {dimension_numbers = #tpu.dot_dimension_numbers<[1], [0], [0], [1], [0, 0, 1, 1], [], []>} : vector<16x128xbf16>, vector<128x128xbf16>, vector<16x128xf32> -> vector<16x128xf32>
    %c0_3 = arith.constant 0 : index
    %c0_4 = arith.constant 0 : index
    %12 = vector.load %arg5[%c0_3, %c0_4] : memref<16x1xf32, #tpu.memory_space<vmem>>, vector<16x1xf32>
    %13 = vector.broadcast %12 : vector<16x1xf32> to vector<16x128xf32>
    %14 = arith.cmpf olt, %13, %11 : vector<16x128xf32>
    %c0_5 = arith.constant 0 : index
    %c0_6 = arith.constant 0 : index
    %15 = vector.load %arg11[%c0_5, %c0_6] : memref<1x128xf32, #tpu.memory_space<vmem>>, vector<1x128xf32>
    %16 = vector.broadcast %15 : vector<1x128xf32> to vector<16x128xf32>
    %17 = arith.cmpf olt, %16, %11 : vector<16x128xf32>
    %18 = arith.ori %14, %17 : vector<16x128xi1>
    %19 = arith.andi %18, %8 : vector<16x128xi1>
    %c0_7 = arith.constant 0 : index
    %c0_8 = arith.constant 0 : index
    %20 = vector.load %arg13[%c0_7, %c0_8] : memref<16x128xi8, #tpu.memory_space<vmem>>, vector<16x128xi8>
    %c0_i8 = arith.constant 0 : i8
    %21 = vector.broadcast %c0_i8 : i8 to vector<16x128xi8>
    %22 = arith.cmpi ne, %20, %21 : vector<16x128xi8>
    %23 = arith.andi %22, %8 : vector<16x128xi1>
    %24 = arith.ori %19, %23 : vector<16x128xi1>
    %c0_9 = arith.constant 0 : index
    %c0_10 = arith.constant 0 : index
    %25 = vector.load %arg3[%c0_9, %c0_10] : memref<16x128xbf16, #tpu.memory_space<vmem>>, vector<16x128xbf16>
    %c0_11 = arith.constant 0 : index
    %c0_12 = arith.constant 0 : index
    %26 = vector.load %arg9[%c0_11, %c0_12] : memref<128x128xbf16, #tpu.memory_space<vmem>>, vector<128x128xbf16>
    %cst_13 = arith.constant dense<0.000000e+00> : vector<16x128xf32>
    %27 = tpu.matmul %25, %26, %cst_13 {dimension_numbers = #tpu.dot_dimension_numbers<[1], [0], [0], [1], [0, 0, 1, 1], [], []>} : vector<16x128xbf16>, vector<128x128xbf16>, vector<16x128xf32> -> vector<16x128xf32>
    %c0_14 = arith.constant 0 : index
    %c0_15 = arith.constant 0 : index
    %28 = vector.load %arg6[%c0_14, %c0_15] : memref<16x1xf32, #tpu.memory_space<vmem>>, vector<16x1xf32>
    %29 = vector.broadcast %28 : vector<16x1xf32> to vector<16x128xf32>
    %30 = arith.cmpf olt, %29, %27 : vector<16x128xf32>
    %c0_16 = arith.constant 0 : index
    %c0_17 = arith.constant 0 : index
    %31 = vector.load %arg12[%c0_16, %c0_17] : memref<1x128xf32, #tpu.memory_space<vmem>>, vector<1x128xf32>
    %32 = vector.broadcast %31 : vector<1x128xf32> to vector<16x128xf32>
    %33 = arith.cmpf olt, %32, %27 : vector<16x128xf32>
    %34 = arith.ori %30, %33 : vector<16x128xi1>
    %35 = arith.andi %34, %8 : vector<16x128xi1>
    %c0_18 = arith.constant 0 : index
    %c0_19 = arith.constant 0 : index
    %36 = vector.load %arg1[%c0_18, %c0_19] : memref<16x128xbf16, #tpu.memory_space<vmem>>, vector<16x128xbf16>
    %c0_20 = arith.constant 0 : index
    %c0_21 = arith.constant 0 : index
    %37 = vector.load %arg7[%c0_20, %c0_21] : memref<128x128xbf16, #tpu.memory_space<vmem>>, vector<128x128xbf16>
    %cst_22 = arith.constant dense<0.000000e+00> : vector<16x128xf32>
    %38 = tpu.matmul %36, %37, %cst_22 {dimension_numbers = #tpu.dot_dimension_numbers<[1], [0], [0], [1], [0, 0, 1, 1], [], []>} : vector<16x128xbf16>, vector<128x128xbf16>, vector<16x128xf32> -> vector<16x128xf32>
    %cst_23 = arith.constant 14.2857141 : f32
    %39 = vector.broadcast %cst_23 : f32 to vector<16x128xf32>
    %40 = arith.mulf %38, %39 : vector<16x128xf32>
    %cst_24 = arith.constant dense<0xFF800000> : vector<16xf32>
    %41 = vector.multi_reduction <maximumf>, %40, %cst_24 [1] : vector<16x128xf32> to vector<16xf32>
    %42 = vector.shape_cast %41 : vector<16xf32> to vector<16x1xf32>
    %43 = vector.broadcast %42 : vector<16x1xf32> to vector<16x128xf32>
    %44 = arith.subf %40, %43 : vector<16x128xf32>
    %45 = math.exp %44 : vector<16x128xf32>
    %cst_25 = arith.constant 0.000000e+00 : f32
    %46 = vector.broadcast %cst_25 : f32 to vector<16x128xf32>
    %47 = arith.select %24, %45, %46 : vector<16x128xi1>, vector<16x128xf32>
    %cst_26 = arith.constant dense<0.000000e+00> : vector<16xf32>
    %48 = vector.multi_reduction <add>, %47, %cst_26 [1] : vector<16x128xf32> to vector<16xf32>
    %49 = vector.shape_cast %48 : vector<16xf32> to vector<16x1xf32>
    %cst_27 = arith.constant 9.99999991E-38 : f32
    %50 = vector.broadcast %cst_27 : f32 to vector<16x1xf32>
    %51 = arith.maximumf %49, %50 : vector<16x1xf32>
    %52 = math.log %51 : vector<16x1xf32>
    %c0_28 = arith.constant 0 : index
    %c0_29 = arith.constant 0 : index
    %53 = vector.load %arg2[%c0_28, %c0_29] : memref<16x128xbf16, #tpu.memory_space<vmem>>, vector<16x128xbf16>
    %c0_30 = arith.constant 0 : index
    %c0_31 = arith.constant 0 : index
    %54 = vector.load %arg8[%c0_30, %c0_31] : memref<128x128xbf16, #tpu.memory_space<vmem>>, vector<128x128xbf16>
    %cst_32 = arith.constant dense<0.000000e+00> : vector<16x128xf32>
    %55 = tpu.matmul %53, %54, %cst_32 {dimension_numbers = #tpu.dot_dimension_numbers<[1], [0], [0], [1], [0, 0, 1, 1], [], []>} : vector<16x128xbf16>, vector<128x128xbf16>, vector<16x128xf32> -> vector<16x128xf32>
    %cst_33 = arith.constant 14.2857141 : f32
    %56 = vector.broadcast %cst_33 : f32 to vector<16x128xf32>
    %57 = arith.mulf %55, %56 : vector<16x128xf32>
    %cst_34 = arith.constant dense<0xFF800000> : vector<16xf32>
    %58 = vector.multi_reduction <maximumf>, %57, %cst_34 [1] : vector<16x128xf32> to vector<16xf32>
    %59 = vector.shape_cast %58 : vector<16xf32> to vector<16x1xf32>
    %60 = vector.broadcast %59 : vector<16x1xf32> to vector<16x128xf32>
    %61 = arith.subf %57, %60 : vector<16x128xf32>
    %62 = math.exp %61 : vector<16x128xf32>
    %cst_35 = arith.constant 0.000000e+00 : f32
    %63 = vector.broadcast %cst_35 : f32 to vector<16x128xf32>
    %64 = arith.select %24, %62, %63 : vector<16x128xi1>, vector<16x128xf32>
    %cst_36 = arith.constant dense<0.000000e+00> : vector<16xf32>
    %65 = vector.multi_reduction <add>, %64, %cst_36 [1] : vector<16x128xf32> to vector<16xf32>
    %66 = vector.shape_cast %65 : vector<16xf32> to vector<16x1xf32>
    %cst_37 = arith.constant 9.99999991E-38 : f32
    %67 = vector.broadcast %cst_37 : f32 to vector<16x1xf32>
    %68 = arith.maximumf %66, %67 : vector<16x1xf32>
    %69 = math.log %68 : vector<16x1xf32>
    %cst_38 = arith.constant 1.000000e+00 : f32
    %cst_39 = arith.constant 0.000000e+00 : f32
    %70 = vector.broadcast %cst_38 : f32 to vector<16x128xf32>
    %71 = vector.broadcast %cst_39 : f32 to vector<16x128xf32>
    %72 = arith.select %19, %70, %71 : vector<16x128xi1>, vector<16x128xf32>
    %cst_40 = arith.constant 5.000000e-01 : f32
    %cst_41 = arith.constant 0.000000e+00 : f32
    %73 = vector.broadcast %cst_40 : f32 to vector<16x128xf32>
    %74 = vector.broadcast %cst_41 : f32 to vector<16x128xf32>
    %75 = arith.select %35, %73, %74 : vector<16x128xi1>, vector<16x128xf32>
    %76 = arith.addf %72, %75 : vector<16x128xf32>
    %cst_42 = arith.constant dense<0.000000e+00> : vector<16xf32>
    %77 = vector.multi_reduction <add>, %72, %cst_42 [1] : vector<16x128xf32> to vector<16xf32>
    %78 = vector.shape_cast %77 : vector<16xf32> to vector<16x1xf32>
    %cst_43 = arith.constant dense<0.000000e+00> : vector<16xf32>
    %79 = vector.multi_reduction <add>, %76, %cst_43 [1] : vector<16x128xf32> to vector<16xf32>
    %80 = vector.shape_cast %79 : vector<16xf32> to vector<16x1xf32>
    %81 = arith.addf %44, %61 : vector<16x128xf32>
    %82 = arith.mulf %76, %81 : vector<16x128xf32>
    %cst_44 = arith.constant dense<0.000000e+00> : vector<16xf32>
    %83 = vector.multi_reduction <add>, %82, %cst_44 [1] : vector<16x128xf32> to vector<16xf32>
    %84 = vector.shape_cast %83 : vector<16xf32> to vector<16x1xf32>
    %85 = arith.addf %52, %69 : vector<16x1xf32>
    %86 = arith.mulf %80, %85 : vector<16x1xf32>
    %87 = arith.subf %84, %86 : vector<16x1xf32>
    %cst_45 = arith.constant 0.000000e+00 : f32
    %88 = vector.broadcast %cst_45 : f32 to vector<16x1xf32>
    %89 = arith.cmpf ogt, %78, %88 : vector<16x1xf32>
    %cst_46 = arith.constant 1.000000e+00 : f32
    %90 = vector.broadcast %cst_46 : f32 to vector<16x1xf32>
    %cst_47 = arith.constant 0.000000e+00 : f32
    %91 = vector.broadcast %cst_47 : f32 to vector<16x1xf32>
    %92 = arith.select %89, %87, %91 : vector<16x1xi1>, vector<16x1xf32>
    %93 = arith.mulf %92, %90 : vector<16x1xf32>
    %cst_48 = arith.constant dense<0.000000e+00> : vector<1xf32>
    %94 = vector.multi_reduction <add>, %93, %cst_48 [0] : vector<16x1xf32> to vector<1xf32>
    %95 = vector.shape_cast %94 : vector<1xf32> to vector<1x1xf32>
    %cst_49 = arith.constant 0.000000e+00 : f32
    %96 = vector.broadcast %cst_49 : f32 to vector<16x1xf32>
    %97 = arith.select %89, %80, %96 : vector<16x1xi1>, vector<16x1xf32>
    %98 = arith.mulf %97, %90 : vector<16x1xf32>
    %cst_50 = arith.constant dense<0.000000e+00> : vector<1xf32>
    %99 = vector.multi_reduction <add>, %98, %cst_50 [0] : vector<16x1xf32> to vector<1xf32>
    %100 = vector.shape_cast %99 : vector<1xf32> to vector<1x1xf32>
    %cst_51 = arith.constant 0.000000e+00 : f32
    %101 = vector.broadcast %cst_51 : f32 to vector<1x1xf32>
    %102 = arith.cmpf ogt, %100, %101 : vector<1x1xf32>
    %cst_52 = arith.constant 1.000000e+00 : f32
    %103 = vector.broadcast %cst_52 : f32 to vector<1x1xf32>
    %104 = arith.select %102, %100, %103 : vector<1x1xi1>, vector<1x1xf32>
    %105 = arith.divf %95, %104 : vector<1x1xf32>
    %cst_53 = arith.constant 0.000000e+00 : f32
    %106 = vector.broadcast %cst_53 : f32 to vector<1x1xf32>
    %107 = arith.select %102, %105, %106 : vector<1x1xi1>, vector<1x1xf32>
    %cst_54 = arith.constant dense<0.000000e+00> : vector<1xf32>
    %108 = vector.multi_reduction <add>, %107, %cst_54 [1] : vector<1x1xf32> to vector<1xf32>
    %109 = vector.shape_cast %108 : vector<1xf32> to vector<1x1xf32>
    %cst_55 = arith.constant -1.000000e+00 : f32
    %110 = vector.broadcast %cst_55 : f32 to vector<1x1xf32>
    %111 = arith.mulf %110, %109 : vector<1x1xf32>
    %cst_56 = arith.constant 0.000000e+00 : f32
    %112 = vector.broadcast %cst_56 : f32 to vector<8x128xf32>
    %113 = vector.broadcast %111 : vector<1x1xf32> to vector<8x128xf32>
    %114 = arith.addf %113, %112 : vector<8x128xf32>
    %c0_57 = arith.constant 0 : index
    %c0_58 = arith.constant 0 : index
    %115 = vector.load %arg14[%c0_57, %c0_58] : memref<8x128xf32, #tpu.memory_space<vmem>>, vector<8x128xf32>
    tpu.vector_store %arg14[%c0_57, %c0_58], %114 {strides = array<i32>} : memref<8x128xf32, #tpu.memory_space<vmem>>, vector<8x128xf32>,
    return
  }
  func.func @transform_0(%arg0: i32) -> (i32, i32) {
    %c0_i32 = arith.constant 0 : i32
    %c0_i32_0 = arith.constant 0 : i32
    return %arg0, %c0_i32 : i32, i32
  }
  func.func @transform_1(%arg0: i32) -> (i32, i32) {
    %c0_i32 = arith.constant 0 : i32
    %c0_i32_0 = arith.constant 0 : i32
    return %arg0, %c0_i32 : i32, i32
  }
  func.func @transform_2(%arg0: i32) -> (i32, i32) {
    %c0_i32 = arith.constant 0 : i32
    %c0_i32_0 = arith.constant 0 : i32
    return %arg0, %c0_i32 : i32, i32
  }
  func.func @transform_3(%arg0: i32) -> (i32, i32) {
    %c0_i32 = arith.constant 0 : i32
    %c0_i32_0 = arith.constant 0 : i32
    return %arg0, %c0_i32 : i32, i32
  }
  func.func @transform_4(%arg0: i32) -> (i32, i32) {
    %c0_i32 = arith.constant 0 : i32
    %c0_i32_0 = arith.constant 0 : i32
    return %arg0, %c0_i32 : i32, i32
  }
  func.func @transform_5(%arg0: i32) -> (i32, i32) {
    %c0_i32 = arith.constant 0 : i32
    %c0_i32_0 = arith.constant 0 : i32
    return %arg0, %c0_i32 : i32, i32
  }
  func.func @transform_6(%arg0: i32) -> (i32, i32) {
    %c0_i32 = arith.constant 0 : i32
    %c0_i32_0 = arith.constant 0 : i32
    %c0_i32_1 = arith.constant 0 : i32
    return %c0_i32, %c0_i32_0 : i32, i32
  }
  func.func @transform_7(%arg0: i32) -> (i32, i32) {
    %c0_i32 = arith.constant 0 : i32
    %c0_i32_0 = arith.constant 0 : i32
    %c0_i32_1 = arith.constant 0 : i32
    return %c0_i32, %c0_i32_0 : i32, i32
  }
  func.func @transform_8(%arg0: i32) -> (i32, i32) {
    %c0_i32 = arith.constant 0 : i32
    %c0_i32_0 = arith.constant 0 : i32
    %c0_i32_1 = arith.constant 0 : i32
    return %c0_i32, %c0_i32_0 : i32, i32
  }
  func.func @transform_9(%arg0: i32) -> (i32, i32) {
    %c0_i32 = arith.constant 0 : i32
    %c0_i32_0 = arith.constant 0 : i32
    %c0_i32_1 = arith.constant 0 : i32
    return %c0_i32, %c0_i32_0 : i32, i32
  }
  func.func @transform_10(%arg0: i32) -> (i32, i32) {
    %c0_i32 = arith.constant 0 : i32
    %c0_i32_0 = arith.constant 0 : i32
    %c0_i32_1 = arith.constant 0 : i32
    return %c0_i32, %c0_i32_0 : i32, i32
  }
  func.func @transform_11(%arg0: i32) -> (i32, i32) {
    %c0_i32 = arith.constant 0 : i32
    %c0_i32_0 = arith.constant 0 : i32
    %c0_i32_1 = arith.constant 0 : i32
    return %c0_i32, %c0_i32_0 : i32, i32
  }
  func.func @transform_12(%arg0: i32) -> (i32, i32) {
    %c0_i32 = arith.constant 0 : i32
    %c0_i32_0 = arith.constant 0 : i32
    %c0_i32_1 = arith.constant 0 : i32
    return %c0_i32, %c0_i32_0 : i32, i32
  }
  func.func @transform_13(%arg0: i32) -> (i32, i32) {
    %c0_i32 = arith.constant 0 : i32
    %c0_i32_0 = arith.constant 0 : i32
    return %arg0, %c0_i32 : i32, i32
  }
}

module attributes {stable_mosaic.version = 11 : i64} {
  func.func @_supcon_tile_kernel(%arg0: i32, %arg1: memref<16x128xbf16, #tpu.memory_space<vmem>>, %arg2: memref<16x128xbf16, #tpu.memory_space<vmem>>, %arg3: memref<16x128xbf16, #tpu.memory_space<vmem>>, %arg4: memref<16x128xbf16, #tpu.memory_space<vmem>>, %arg5: memref<16x1xf32, #tpu.memory_space<vmem>>, %arg6: memref<16x1xf32, #tpu.memory_space<vmem>>, %arg7: memref<128x128xbf16, #tpu.memory_space<vmem>>, %arg8: memref<128x128xbf16, #tpu.memory_space<vmem>>, %arg9: memref<128x128xbf16, #tpu.memory_space<vmem>>, %arg10: memref<128x128xbf16, #tpu.memory_space<vmem>>, %arg11: memref<1x128xf32, #tpu.memory_space<vmem>>, %arg12: memref<1x128xf32, #tpu.memory_space<vmem>>, %arg13: memref<16x128xi8, #tpu.memory_space<vmem>>, %arg14: memref<8x128xf32, #tpu.memory_space<vmem>>) attributes {dimension_semantics = [#tpu.dimension_semantics<parallel>], iteration_bounds = array<i64: 2>, scalar_prefetch = 0 : i64, scratch_operands = 0 : i64, tpu.core_type = #tpu.core_type<tc>, window_params = [{transform_indices = @transform_0, window_bounds = array<i64: 16, 128>}, {transform_indices = @transform_1, window_bounds = array<i64: 16, 128>}, {transform_indices = @transform_2, window_bounds = array<i64: 16, 128>}, {transform_indices = @transform_3, window_bounds = array<i64: 16, 128>}, {transform_indices = @transform_4, window_bounds = array<i64: 16, 1>}, {transform_indices = @transform_5, window_bounds = array<i64: 16, 1>}, {pipeline_mode = #tpu.pipeline_mode<synchronous>, transform_indices = @transform_6, window_bounds = array<i64: 128, 128>}, {pipeline_mode = #tpu.pipeline_mode<synchronous>, transform_indices = @transform_7, window_bounds = array<i64: 128, 128>}, {pipeline_mode = #tpu.pipeline_mode<synchronous>, transform_indices = @transform_8, window_bounds = array<i64: 128, 128>}, {pipeline_mode = #tpu.pipeline_mode<synchronous>, transform_indices = @transform_9, window_bounds = array<i64: 128, 128>}, {pipeline_mode = #tpu.pipeline_mode<synchronous>, transform_indices = @transform_10, window_bounds = array<i64: 1, 128>}, {pipeline_mode = #tpu.pipeline_mode<synchronous>, transform_indices = @transform_11, window_bounds = array<i64: 1, 128>}, {pipeline_mode = #tpu.pipeline_mode<synchronous>, transform_indices = @transform_12, window_bounds = array<i64: 16, 128>}, {transform_indices = @transform_13, window_bounds = array<i64: 8, 128>}]} {
    %c16_i32 = arith.constant 16 : i32
    %0 = arith.muli %arg0, %c16_i32 : i32
    %1 = tpu.iota {dimensions = array<i32: 1>} : vector<16x128xi32>
    %2 = tpu.iota {dimensions = array<i32: 0>} : vector<16x128xi32>
    %3 = arith.subi %1, %2 : vector<16x128xi32>
    %4 = vector.broadcast %0 : i32 to vector<16x128xi32>
    %5 = arith.cmpi ne, %3, %4 : vector<16x128xi32>
    %c32_i32 = arith.constant 32 : i32
    %6 = vector.broadcast %c32_i32 : i32 to vector<16x128xi32>
    %7 = arith.cmpi slt, %1, %6 : vector<16x128xi32>
    %8 = arith.andi %5, %7 : vector<16x128xi1>
    %c0 = arith.constant 0 : index
    %c0_0 = arith.constant 0 : index
    %9 = vector.load %arg4[%c0, %c0_0] : memref<16x128xbf16, #tpu.memory_space<vmem>>, vector<16x128xbf16>
    %c0_1 = arith.constant 0 : index
    %c0_2 = arith.constant 0 : index
    %10 = vector.load %arg10[%c0_1, %c0_2] : memref<128x128xbf16, #tpu.memory_space<vmem>>, vector<128x128xbf16>
    %cst = arith.constant dense<0.000000e+00> : vector<16x128xf32>
    %11 = tpu.matmul %9, %10, %cst {dimension_numbers = #tpu.dot_dimension_numbers<[1], [0], [0], [1], [0, 0, 1, 1], [], []>} : vector<16x128xbf16>, vector<128x128xbf16>, vector<16x128xf32> -> vector<16x128xf32>
    %c0_3 = arith.constant 0 : index
    %c0_4 = arith.constant 0 : index
    %12 = vector.load %arg5[%c0_3, %c0_4] : memref<16x1xf32, #tpu.memory_space<vmem>>, vector<16x1xf32>
    %13 = vector.broadcast %12 : vector<16x1xf32> to vector<16x128xf32>
    %14 = arith.cmpf olt, %13, %11 : vector<16x128xf32>
    %c0_5 = arith.constant 0 : index
    %c0_6 = arith.constant 0 : index
    %15 = vector.load %arg11[%c0_5, %c0_6] : memref<1x128xf32, #tpu.memory_space<vmem>>, vector<1x128xf32>
    %16 = vector.broadcast %15 : vector<1x128xf32> to vector<16x128xf32>
    %17 = arith.cmpf olt, %16, %11 : vector<16x128xf32>
    %18 = arith.ori %14, %17 : vector<16x128xi1>
    %19 = arith.andi %18, %8 : vector<16x128xi1>
    %c0_7 = arith.constant 0 : index
    %c0_8 = arith.constant 0 : index
    %20 = vector.load %arg13[%c0_7, %c0_8] : memref<16x128xi8, #tpu.memory_space<vmem>>, vector<16x128xi8>
    %c0_i8 = arith.constant 0 : i8
    %21 = vector.broadcast %c0_i8 : i8 to vector<16x128xi8>
    %22 = arith.cmpi ne, %20, %21 : vector<16x128xi8>
    %23 = arith.andi %22, %8 : vector<16x128xi1>
    %24 = arith.ori %19, %23 : vector<16x128xi1>
    %c0_9 = arith.constant 0 : index
    %c0_10 = arith.constant 0 : index
    %25 = vector.load %arg3[%c0_9, %c0_10] : memref<16x128xbf16, #tpu.memory_space<vmem>>, vector<16x128xbf16>
    %c0_11 = arith.constant 0 : index
    %c0_12 = arith.constant 0 : index
    %26 = vector.load %arg9[%c0_11, %c0_12] : memref<128x128xbf16, #tpu.memory_space<vmem>>, vector<128x128xbf16>
    %cst_13 = arith.constant dense<0.000000e+00> : vector<16x128xf32>
    %27 = tpu.matmul %25, %26, %cst_13 {dimension_numbers = #tpu.dot_dimension_numbers<[1], [0], [0], [1], [0, 0, 1, 1], [], []>} : vector<16x128xbf16>, vector<128x128xbf16>, vector<16x128xf32> -> vector<16x128xf32>
    %c0_14 = arith.constant 0 : index
    %c0_15 = arith.constant 0 : index
    %28 = vector.load %arg6[%c0_14, %c0_15] : memref<16x1xf32, #tpu.memory_space<vmem>>, vector<16x1xf32>
    %29 = vector.broadcast %28 : vector<16x1xf32> to vector<16x128xf32>
    %30 = arith.cmpf olt, %29, %27 : vector<16x128xf32>
    %c0_16 = arith.constant 0 : index
    %c0_17 = arith.constant 0 : index
    %31 = vector.load %arg12[%c0_16, %c0_17] : memref<1x128xf32, #tpu.memory_space<vmem>>, vector<1x128xf32>
    %32 = vector.broadcast %31 : vector<1x128xf32> to vector<16x128xf32>
    %33 = arith.cmpf olt, %32, %27 : vector<16x128xf32>
    %34 = arith.ori %30, %33 : vector<16x128xi1>
    %35 = arith.andi %34, %8 : vector<16x128xi1>
    %c0_18 = arith.constant 0 : index
    %c0_19 = arith.constant 0 : index
    %36 = vector.load %arg1[%c0_18, %c0_19] : memref<16x128xbf16, #tpu.memory_space<vmem>>, vector<16x128xbf16>
    %c0_20 = arith.constant 0 : index
    %c0_21 = arith.constant 0 : index
    %37 = vector.load %arg7[%c0_20, %c0_21] : memref<128x128xbf16, #tpu.memory_space<vmem>>, vector<128x128xbf16>
    %cst_22 = arith.constant dense<0.000000e+00> : vector<16x128xf32>
    %38 = tpu.matmul %36, %37, %cst_22 {dimension_numbers = #tpu.dot_dimension_numbers<[1], [0], [0], [1], [0, 0, 1, 1], [], []>} : vector<16x128xbf16>, vector<128x128xbf16>, vector<16x128xf32> -> vector<16x128xf32>
    %cst_23 = arith.constant 14.2857141 : f32
    %39 = vector.broadcast %cst_23 : f32 to vector<16x128xf32>
    %40 = arith.mulf %38, %39 : vector<16x128xf32>
    %cst_24 = arith.constant dense<0xFF800000> : vector<16xf32>
    %41 = vector.multi_reduction <maximumf>, %40, %cst_24 [1] : vector<16x128xf32> to vector<16xf32>
    %42 = vector.shape_cast %41 : vector<16xf32> to vector<16x1xf32>
    %43 = vector.broadcast %42 : vector<16x1xf32> to vector<16x128xf32>
    %44 = arith.subf %40, %43 : vector<16x128xf32>
    %45 = math.exp %44 : vector<16x128xf32>
    %cst_25 = arith.constant 0.000000e+00 : f32
    %46 = vector.broadcast %cst_25 : f32 to vector<16x128xf32>
    %47 = arith.select %24, %45, %46 : vector<16x128xi1>, vector<16x128xf32>
    %cst_26 = arith.constant dense<0.000000e+00> : vector<16xf32>
    %48 = vector.multi_reduction <add>, %47, %cst_26 [1] : vector<16x128xf32> to vector<16xf32>
    %49 = vector.shape_cast %48 : vector<16xf32> to vector<16x1xf32>
    %cst_27 = arith.constant 9.99999991E-38 : f32
    %50 = vector.broadcast %cst_27 : f32 to vector<16x1xf32>
    %51 = arith.maximumf %49, %50 : vector<16x1xf32>
    %52 = math.log %51 : vector<16x1xf32>
    %c0_28 = arith.constant 0 : index
    %c0_29 = arith.constant 0 : index
    %53 = vector.load %arg2[%c0_28, %c0_29] : memref<16x128xbf16, #tpu.memory_space<vmem>>, vector<16x128xbf16>
    %c0_30 = arith.constant 0 : index
    %c0_31 = arith.constant 0 : index
    %54 = vector.load %arg8[%c0_30, %c0_31] : memref<128x128xbf16, #tpu.memory_space<vmem>>, vector<128x128xbf16>
    %cst_32 = arith.constant dense<0.000000e+00> : vector<16x128xf32>
    %55 = tpu.matmul %53, %54, %cst_32 {dimension_numbers = #tpu.dot_dimension_numbers<[1], [0], [0], [1], [0, 0, 1, 1], [], []>} : vector<16x128xbf16>, vector<128x128xbf16>, vector<16x128xf32> -> vector<16x128xf32>
    %cst_33 = arith.constant 14.2857141 : f32
    %56 = vector.broadcast %cst_33 : f32 to vector<16x128xf32>
    %57 = arith.mulf %55, %56 : vector<16x128xf32>
    %cst_34 = arith.constant dense<0xFF800000> : vector<16xf32>
    %58 = vector.multi_reduction <maximumf>, %57, %cst_34 [1] : vector<16x128xf32> to vector<16xf32>
    %59 = vector.shape_cast %58 : vector<16xf32> to vector<16x1xf32>
    %60 = vector.broadcast %59 : vector<16x1xf32> to vector<16x128xf32>
    %61 = arith.subf %57, %60 : vector<16x128xf32>
    %62 = math.exp %61 : vector<16x128xf32>
    %cst_35 = arith.constant 0.000000e+00 : f32
    %63 = vector.broadcast %cst_35 : f32 to vector<16x128xf32>
    %64 = arith.select %24, %62, %63 : vector<16x128xi1>, vector<16x128xf32>
    %cst_36 = arith.constant dense<0.000000e+00> : vector<16xf32>
    %65 = vector.multi_reduction <add>, %64, %cst_36 [1] : vector<16x128xf32> to vector<16xf32>
    %66 = vector.shape_cast %65 : vector<16xf32> to vector<16x1xf32>
    %cst_37 = arith.constant 9.99999991E-38 : f32
    %67 = vector.broadcast %cst_37 : f32 to vector<16x1xf32>
    %68 = arith.maximumf %66, %67 : vector<16x1xf32>
    %69 = math.log %68 : vector<16x1xf32>
    %cst_38 = arith.constant 1.000000e+00 : f32
    %cst_39 = arith.constant 0.000000e+00 : f32
    %70 = vector.broadcast %cst_38 : f32 to vector<16x128xf32>
    %71 = vector.broadcast %cst_39 : f32 to vector<16x128xf32>
    %72 = arith.select %19, %70, %71 : vector<16x128xi1>, vector<16x128xf32>
    %cst_40 = arith.constant 5.000000e-01 : f32
    %cst_41 = arith.constant 0.000000e+00 : f32
    %73 = vector.broadcast %cst_40 : f32 to vector<16x128xf32>
    %74 = vector.broadcast %cst_41 : f32 to vector<16x128xf32>
    %75 = arith.select %35, %73, %74 : vector<16x128xi1>, vector<16x128xf32>
    %76 = arith.addf %72, %75 : vector<16x128xf32>
    %cst_42 = arith.constant dense<0.000000e+00> : vector<16xf32>
    %77 = vector.multi_reduction <add>, %72, %cst_42 [1] : vector<16x128xf32> to vector<16xf32>
    %78 = vector.shape_cast %77 : vector<16xf32> to vector<16x1xf32>
    %cst_43 = arith.constant dense<0.000000e+00> : vector<16xf32>
    %79 = vector.multi_reduction <add>, %76, %cst_43 [1] : vector<16x128xf32> to vector<16xf32>
    %80 = vector.shape_cast %79 : vector<16xf32> to vector<16x1xf32>
    %81 = arith.addf %44, %61 : vector<16x128xf32>
    %82 = arith.mulf %76, %81 : vector<16x128xf32>
    %cst_44 = arith.constant dense<0.000000e+00> : vector<16xf32>
    %83 = vector.multi_reduction <add>, %82, %cst_44 [1] : vector<16x128xf32> to vector<16xf32>
    %84 = vector.shape_cast %83 : vector<16xf32> to vector<16x1xf32>
    %85 = arith.addf %52, %69 : vector<16x1xf32>
    %86 = arith.mulf %80, %85 : vector<16x1xf32>
    %87 = arith.subf %84, %86 : vector<16x1xf32>
    %cst_45 = arith.constant 0.000000e+00 : f32
    %88 = vector.broadcast %cst_45 : f32 to vector<16x1xf32>
    %89 = arith.cmpf ogt, %78, %88 : vector<16x1xf32>
    %cst_46 = arith.constant 1.000000e+00 : f32
    %90 = vector.broadcast %cst_46 : f32 to vector<16x1xf32>
    %cst_47 = arith.constant 0.000000e+00 : f32
    %91 = vector.broadcast %cst_47 : f32 to vector<16x1xf32>
    %92 = arith.select %89, %87, %91 : vector<16x1xi1>, vector<16x1xf32>
    %93 = arith.mulf %92, %90 : vector<16x1xf32>
    %cst_48 = arith.constant dense<0.000000e+00> : vector<1xf32>
    %94 = vector.multi_reduction <add>, %93, %cst_48 [0] : vector<16x1xf32> to vector<1xf32>
    %95 = vector.shape_cast %94 : vector<1xf32> to vector<1x1xf32>
    %cst_49 = arith.constant 0.000000e+00 : f32
    %96 = vector.broadcast %cst_49 : f32 to vector<16x1xf32>
    %97 = arith.select %89, %80, %96 : vector<16x1xi1>, vector<16x1xf32>
    %98 = arith.mulf %97, %90 : vector<16x1xf32>
    %cst_50 = arith.constant dense<0.000000e+00> : vector<1xf32>
    %99 = vector.multi_reduction <add>, %98, %cst_50 [0] : vector<16x1xf32> to vector<1xf32>
    %100 = vector.shape_cast %99 : vector<1xf32> to vector<1x1xf32>
    %cst_51 = arith.constant 0.000000e+00 : f32
    %101 = vector.broadcast %cst_51 : f32 to vector<1x1xf32>
    %102 = arith.cmpf ogt, %100, %101 : vector<1x1xf32>
    %cst_52 = arith.constant 1.000000e+00 : f32
    %103 = vector.broadcast %cst_52 : f32 to vector<1x1xf32>
    %104 = arith.select %102, %100, %103 : vector<1x1xi1>, vector<1x1xf32>
    %105 = arith.divf %95, %104 : vector<1x1xf32>
    %cst_53 = arith.constant 0.000000e+00 : f32
    %106 = vector.broadcast %cst_53 : f32 to vector<1x1xf32>
    %107 = arith.select %102, %105, %106 : vector<1x1xi1>, vector<1x1xf32>
    %cst_54 = arith.constant dense<0.000000e+00> : vector<1xf32>
    %108 = vector.multi_reduction <add>, %107, %cst_54 [1] : vector<1x1xf32> to vector<1xf32>
    %109 = vector.shape_cast %108 : vector<1xf32> to vector<1x1xf32>
    %cst_55 = arith.constant -1.000000e+00 : f32
    %110 = vector.broadcast %cst_55 : f32 to vector<1x1xf32>
    %111 = arith.mulf %110, %109 : vector<1x1xf32>
    %cst_56 = arith.constant 0.000000e+00 : f32
    %112 = vector.broadcast %cst_56 : f32 to vector<8x128xf32>
    %113 = vector.broadcast %111 : vector<1x1xf32> to vector<8x128xf32>
    %114 = arith.addf %113, %112 : vector<8x128xf32>
    %c0_57 = arith.constant 0 : index
    %c0_58 = arith.constant 0 : index
    %115 = vector.load %arg14[%c0_57, %c0_58] : memref<8x128xf32, #tpu.memory_space<vmem>>, vector<8x128xf32>
    tpu.vector_store %arg14[%c0_57, %c0_58], %114 {strides = array<i32>} : memref<8x128xf32, #tpu.memory_space<vmem>>, vector<8x128xf32>,
    return
  }
  func.func @transform_0(%arg0: i32) -> (i32, i32) {
    %c0_i32 = arith.constant 0 : i32
    %c0_i32_0 = arith.constant 0 : i32
    return %arg0, %c0_i32 : i32, i32
  }
  func.func @transform_1(%arg0: i32) -> (i32, i32) {
    %c0_i32 = arith.constant 0 : i32
    %c0_i32_0 = arith.constant 0 : i32
    return %arg0, %c0_i32 : i32, i32
  }
  func.func @transform_2(%arg0: i32) -> (i32, i32) {
    %c0_i32 = arith.constant 0 : i32
    %c0_i32_0 = arith.constant 0 : i32
    return %arg0, %c0_i32 : i32, i32
  }
  func.func @transform_3(%arg0: i32) -> (i32, i32) {
    %c0_i32 = arith.constant 0 : i32
    %c0_i32_0 = arith.constant 0 : i32
    return %arg0, %c0_i32 : i32, i32
  }
  func.func @transform_4(%arg0: i32) -> (i32, i32) {
    %c0_i32 = arith.constant 0 : i32
    %c0_i32_0 = arith.constant 0 : i32
    return %arg0, %c0_i32 : i32, i32
  }
  func.func @transform_5(%arg0: i32) -> (i32, i32) {
    %c0_i32 = arith.constant 0 : i32
    %c0_i32_0 = arith.constant 0 : i32
    return %arg0, %c0_i32 : i32, i32
  }
  func.func @transform_6(%arg0: i32) -> (i32, i32) {
    %c0_i32 = arith.constant 0 : i32
    %c0_i32_0 = arith.constant 0 : i32
    %c0_i32_1 = arith.constant 0 : i32
    return %c0_i32, %c0_i32_0 : i32, i32
  }
  func.func @transform_7(%arg0: i32) -> (i32, i32) {
    %c0_i32 = arith.constant 0 : i32
    %c0_i32_0 = arith.constant 0 : i32
    %c0_i32_1 = arith.constant 0 : i32
    return %c0_i32, %c0_i32_0 : i32, i32
  }
  func.func @transform_8(%arg0: i32) -> (i32, i32) {
    %c0_i32 = arith.constant 0 : i32
    %c0_i32_0 = arith.constant 0 : i32
    %c0_i32_1 = arith.constant 0 : i32
    return %c0_i32, %c0_i32_0 : i32, i32
  }
  func.func @transform_9(%arg0: i32) -> (i32, i32) {
    %c0_i32 = arith.constant 0 : i32
    %c0_i32_0 = arith.constant 0 : i32
    %c0_i32_1 = arith.constant 0 : i32
    return %c0_i32, %c0_i32_0 : i32, i32
  }
  func.func @transform_10(%arg0: i32) -> (i32, i32) {
    %c0_i32 = arith.constant 0 : i32
    %c0_i32_0 = arith.constant 0 : i32
    %c0_i32_1 = arith.constant 0 : i32
    return %c0_i32, %c0_i32_0 : i32, i32
  }
  func.func @transform_11(%arg0: i32) -> (i32, i32) {
    %c0_i32 = arith.constant 0 : i32
    %c0_i32_0 = arith.constant 0 : i32
    %c0_i32_1 = arith.constant 0 : i32
    return %c0_i32, %c0_i32_0 : i32, i32
  }
  func.func @transform_12(%arg0: i32) -> (i32, i32) {
    %c0_i32 = arith.constant 0 : i32
    %c0_i32_0 = arith.constant 0 : i32
    %c0_i32_1 = arith.constant 0 : i32
    return %c0_i32, %c0_i32_0 : i32, i32
  }
  func.func @transform_13(%arg0: i32) -> (i32, i32) {
    %c0_i32 = arith.constant 0 : i32
    %c0_i32_0 = arith.constant 0 : i32
    return %arg0, %c0_i32 : i32, i32
  }
}

</mosaic_0001>

<bundles_post_ra>
// kernel: tpu_custom_call.1
= control target key start
LH: loop header
LB: loop body
LE: loop exit
PB: predicated region body
PF: predicated region fallthrough
CT: control target
= control target key end

     0   :  { %s2692_s0 = inlined_call_operand.vmem [shape: bf16[32,128], index: 0, kind: input, shape index: {}]   ;;  %s2693_s1 = inlined_call_operand.hbm [shape: bf16[32,128], index: 1, kind: input, shape index: {}]   ;;  %s2694_s2 = inlined_call_operand.hbm [shape: bf16[32,128], index: 2, kind: input, shape index: {}]   ;;  %s2695_s3 = inlined_call_operand.hbm [shape: bf16[32,128], index: 3, kind: input, shape index: {}]   ;;  %s2696_s4 = inlined_call_operand.vmem [shape: f32[32,1], index: 4, kind: input, shape index: {}]   ;;  %s2697_s5 = inlined_call_operand.vmem [shape: f32[32,1], index: 5, kind: input, shape index: {}]   ;;  %s2698_s6 = inlined_call_operand.vmem [shape: bf16[128,128], index: 6, kind: input, shape index: {}]   ;;  %s2699_s7 = inlined_call_operand.hbm [shape: bf16[128,128], index: 7, kind: input, shape index: {}]   ;;  %s2700_s8 = inlined_call_operand.hbm [shape: bf16[128,128], index: 8, kind: input, shape index: {}]   ;;  %s2701_s9 = inlined_call_operand.hbm [shape: bf16[128,128], index: 9, kind: input, shape index: {}]   ;;  %s2702_s10 = inlined_call_operand.vmem [shape: f32[1,128], index: 10, kind: input, shape index: {}]   ;;  %s2703_s11 = inlined_call_operand.vmem [shape: f32[1,128], index: 11, kind: input, shape index: {}]   ;;  %s2704_s12 = inlined_call_operand.vmem [shape: s8[16,128], index: 12, kind: input, shape index: {}]   ;;  %s2705_s13 = inlined_call_operand.hbm [shape: f32[16,128], index: 13, kind: output, shape index: {}]  }
   0x1   :  { %2733 = sst [smem:[#allocation25_spill]] %s2692_s0 }
   0x2   :  { %2734 = sst [smem:[#allocation26_spill]] %s2694_s2 }
   0x3   :  { %2735 = sst [smem:[#allocation27_spill]] %s2696_s4 }
   0x4   :  { %2736 = sst [smem:[#allocation28_spill]] %s2697_s5 }
   0x5   :  { %2737 = sst [smem:[#allocation29_spill]] %s2698_s6 }
   0x6   :  { %2738 = sst [smem:[#allocation30_spill]] %s2699_s7 }
   0x7   :  { %2739 = sst [smem:[#allocation31_spill]] %s2702_s10 }
   0x8   :  { %2740 = sst [smem:[#allocation32_spill]] %s2703_s11 }
   0x9   :  { %2741 = sst [smem:[#allocation33_spill]] %s2704_s12 }
   0xa   :  { %2742 = sst [smem:[#allocation34_spill]] %s2705_s13 }
   0xb   :  { %18 = vsyncpa [#allocation3], 0 }
   0xc   :  { %20 = vsyncpa [#allocation3 + $0x1], 0 }
   0xd   :  { %21 = vsyncpa [#allocation6], 0 }
   0xe   :  { %23 = vsyncpa [#allocation6 + $0x1], 0 }
   0xf   :  { %24 = vsyncpa [#allocation9], 0 }
  0x10   :  { %25 = vsyncpa [#allocation12], 0 }
  0x11   :  { %26 = vsyncpa [#allocation4], 0 }
  0x12   :  { %28 = vsyncpa [#allocation4 + $0x1], 0  ;;  %s2162_s25 = smov 0   ;;  %s2164_s26 = smov 0  }
  0x13   :  { %s2166_s27 = smov 0   ;;  %s2168_s28 = smov 0  }
  0x14 LB: > { %2743 = sst [smem:[#allocation19_spill]] %s2066_s25  ;;  %s2183_s29 = sadd.s32 4294967295, %s2078_s28   ;;  %s2078_s28 = sphi %s2168_s28, %s2798_s28   ;;  %s2074_s27 = sphi %s2166_s27, %s2802_s27   ;;  %s2070_s26 = sphi %s2164_s26, %s2801_s26   ;;  %s2066_s25 = sphi %s2162_s25, %s2800_s25  }
  0x15   : > { %2744 = sst [smem:[#allocation20_spill]] %s2078_s28  ;;  %s1487_s30 = sadd.s32 4294967294, %s2078_s28  }
  0x16   : > { %s2187_s14 = sadd.s32 1, %s2078_s28   ;;  %s67_s15 = sadd.s32 1, %s2074_s27 }
  0x17   : > { %2745 = sst [smem:[#allocation21_spill]] %s2187_s14  ;;  %s64_s16 = ssub.s32 %s2078_s28, %s2187_s14 }
  0x18   : > { %p74_p0 = scmp.ne.s32.totalorder %s2074_s27, %s2070_s26  ;;  %p65_p1 = scmp.eq.s32.totalorder %s64_s16, 0 }
  0x19   : > { %p75_p2 = scmp.eq.s32.totalorder %s2078_s28, 0  ;;  %p80_p3 = scmp.ne.s32.totalorder %s2070_s26, %s2066_s25 }
  0x1a   : > { %p2714_p4 = scmp.eq.s32.totalorder %s2183_s29, 0  ;;  %p355_p7 = scmp.eq.s32.totalorder %s2183_s29, 1 }
  0x1b   : > { %s2199_s17 = scalar_select %p65_p1, %s2074_s27, %s67_s15  }
  0x1c   : > { %p2201_p5 = por %p75_p2, %p74_p0  ;;  %p2207_p6 = por %p2714_p4, %p80_p3 }
  0x1d   : > { %2746 = sst [smem:[#allocation22_spill]] %s2199_s17  ;;  %p361_p8 = scmp.eq.s32.totalorder %s1487_s30, 1 }
  0x1e   : > { %s2747_s18 = scalar_select %p2201_p5, 1, 0 }
  0x1f   : > { %s2748_s19 = scalar_select %p2207_p6, 1, 0 }
  0x20   : > { %p1488_p9 = scmp.ge.s32.totalorder %s2078_s28, 1  ;;  %p368_p10 = scmp.lt.s32.totalorder %s2078_s28, 3 }
  0x21   : > { %p2214_p11 = por %p355_p7, %p74_p0  ;;  %p2218_p12 = por %p361_p8, %p80_p3 }
  0x22   : > { %p2222_p13 = pnand %p1488_p9, %p368_p10  ;;  %s2080_s23 = smov [#allocation8]  }
  0x23   : > { %s2749_s20 = scalar_select %p2214_p11, 1, 0 }
  0x24   : > { %s2751_s21 = scalar_select %p2218_p12, 1, 0 }
  0x25   : > { %2750 = sst [smem:[#allocation23_spill]] %s2749_s20  ;;  %p1698_p1 = pneg %p2222_p13 }
  0x26   : > { %2752 = sst [smem:[#allocation24_spill]] %s2751_s21  ;;  %s383_s24 = sshll.u32 %s2080_s23, 4  ;;  %s384_s24 = int_to_ptr.vmem [resolvable:$true] %s383_s24 }
  0x27   : > { %s2753_s22 = scalar_select %p2222_p13, 1, 0 }
  0x28   : > { %p2230_p2 = pnand %p1698_p1, %p2714_p4  ;;  %s2713_s15 = sand.u32 1, %s2074_s27  }
  0x29   : > { %s2239_s16 = sshll.u32 %s2713_s15, 3  ;;  %s2755_s7 = sld [smem:[#allocation30_spill]] }
  0x2a   : > { %s2754_s30 = scalar_select %p2230_p2, 1, 0 }
  0x2b   : > { %p2249_p8 = pneg %p2230_p2 }
  0x2d   : > { %s2756_s23 = scalar_select %p2249_p8, 1, 0 }
  0x2f   : > { %s1826_s21 = scalar_lea.hbm %s2755_s7, 1024 }
  0x30   : > { %p1827_p7 = scmp.ne.s32.totalorder %s2755_s7, %s1826_s21  ;;  %p1833_p1 = scmp.lt.u32.totalorder %s1826_s21, %s2755_s7 }
  0x32   : > { %p1829_p9 = pnand %p2249_p8, %p1827_p7 }
  0x34   : > { %p1830_p10 = pneg %p1829_p9 }
  0x36   : > { %p1835_p0 = pnand %p1833_p1, %p1830_p10 }
  0x38   : > { %1838 = shalt.err (!%p1835_p0)
}
  0x39   : > { %s1839_s14 = scalar_lea.vmem %s384_s24, 1024  ;;  %p1847_p11 = scmp.lt.s32.totalorder %s384_s24, %s384_s24 }
  0x3a   : > { %p1840_p4 = scmp.ne.s32.totalorder %s384_s24, %s1839_s14  ;;  %p1848_p6 = scmp.lt.s32.totalorder %s1839_s14, %s1839_s14 }
  0x3c   : > { %p1842_p3 = pnand %p1840_p4, %p2249_p8  ;;  %p1849_p13 = por %p1848_p6, %p1847_p11 }
  0x3e   : > { %p1843_p12 = pneg %p1842_p3 }
  0x40   : > { %p1850_p5 = pnand %p1849_p13, %p1843_p12 }
  0x42   : > { %1853 = shalt.err (!%p1850_p5)
}
  0x43   : > { %s2719_s13 = smov 64   ;;  %s2721_s25 = smov 4  }
  0x44   : > { %1701 = dma.hbm_to_vmem [thread:$0]  (!%p2230_p2), %s2755_s7, 1024, %s384_s24, [#allocation9], %s2719_s13, %s2719_s13, %s2721_s25  }
  0x45   : > { %s2269_s21 = sshll.u32 %s2078_s28, 7  ;;  %p2757_p4 = scmp.ne.s32.totalorder %s2747_s18, 0 }
  0x46   : > { %p2758_p5 = scmp.lt.s32.totalorder %s2078_s28, 2  ;;  %s462_s14 = sand.u32 1, %s2078_s28  }
  0x47   : > { %s2760_s2 = sld [smem:[#allocation26_spill]]  ;;  %s466_s24 = scalar_lea.vmem [#allocation5], %s2239_s16 }
  0x48   : > { %p2275_p6 = pnand %p2758_p5, %p2757_p4  ;;  %s473_s17 = sshll.u32 %s466_s24, 4  ;;  %s2287_s17 = int_to_ptr.vmem [resolvable:$true] %s473_s17 }
  0x49   : > { %s2289_s18 = scalar_lea.sflag [#allocation6], %s462_s14 }
  0x4a   : > { %s2759_s15 = scalar_select %p2275_p6, 1, 0 }
  0x4b   : > { %p2295_p12 = pneg %p2275_p6 }
  0x4d   : > { %s2284_s12 = scalar_lea.hbm %s2760_s2, %s2269_s21  ;;  %s1859_s25 = scalar_lea.hbm %s2760_s2, 256 }
  0x4e   : > { %s1854_s20 = scalar_lea.hbm %s2284_s12, 128  ;;  %p1860_p3 = scmp.lt.u32.totalorder %s2284_s12, %s2760_s2 }
  0x4f   : > { %p1855_p11 = scmp.ne.s32.totalorder %s2284_s12, %s1854_s20  ;;  %p1861_p7 = scmp.lt.u32.totalorder %s1859_s25, %s1854_s20 }
  0x50   : > { %s2761_s13 = scalar_select %p2295_p12, 1, 0 }
  0x51   : > { %p1857_p13 = pnand %p2295_p12, %p1855_p11  ;;  %p1862_p9 = por %p1861_p7, %p1860_p3 }
  0x52   : > { %p1863_p10 = scmp.lt.u32.totalorder %s1854_s20, %s2284_s12 }
  0x53   : > { %p1858_p0 = pneg %p1857_p13 }
  0x54   : > { %p1864_p1 = por %p1863_p10, %p1862_p9 }
  0x56   : > { %p1865_p4 = pnand %p1864_p1, %p1858_p0 }
  0x58   : > { %1868 = shalt.err (!%p1865_p4)
}
  0x59   : > { %s1869_s14 = scalar_lea.vmem %s2287_s17, 128  ;;  %s2083_s10 = smov [#allocation5]  }
  0x5a   : > { %p1870_p5 = scmp.ne.s32.totalorder %s2287_s17, %s1869_s14  ;;  %s1874_s11 = sshll.u32 %s2083_s10, 4  ;;  %s1875_s11 = int_to_ptr.vmem [resolvable:$false] %s1874_s11 }
  0x5b   : > { %s1876_s7 = scalar_lea.vmem %s1875_s11, 256  ;;  %p1877_p2 = scmp.lt.s32.totalorder %s2287_s17, %s1875_s11 }
  0x5c   : > { %p1872_p11 = pnand %p1870_p5, %p2295_p12  ;;  %p1878_p8 = scmp.lt.s32.totalorder %s1876_s7, %s1869_s14 }
  0x5e   : > { %p1873_p13 = pneg %p1872_p11  ;;  %p1879_p3 = por %p1878_p8, %p1877_p2 }
  0x60   : > { %p1880_p7 = pnand %p1879_p3, %p1873_p13 }
  0x62   : > { %1883 = shalt.err (!%p1880_p7)
}
  0x63   : > { %s2762_s25 = smov 4   ;;  %s2763_s20 = smov 64  }
  0x64   : > { %1714 = dma.hbm_to_vmem [thread:$0]  (!%p2275_p6), %s2284_s12, 128, %s2287_s17, %s2289_s18, %s2763_s20, %s2763_s20, %s2762_s25  }
  0x65   : > { %s2084_s24 = smov [#allocation10]   ;;  %s2085_s10 = smov [#allocation11]  }
  0x66   : > { %s396_s2 = sshll.u32 %s2084_s24, 4  ;;  %s409_s28 = sshll.u32 %s2085_s10, 4  ;;  %s397_s2 = int_to_ptr.vmem [resolvable:$true] %s396_s2  ;;  %s410_s28 = int_to_ptr.vmem [resolvable:$true] %s409_s28 }
  0x67   : > { %s1884_s7 = scalar_lea.hbm %s2700_s8, 1024  ;;  %p2764_p8 = scmp.ne.s32.totalorder %s2756_s23, 0 }
  0x68   : > { %p1885_p2 = scmp.ne.s32.totalorder %s2700_s8, %s1884_s7  ;;  %p1891_p10 = scmp.lt.u32.totalorder %s1884_s7, %s2700_s8 }
  0x6a   : > { %p1887_p0 = pnand %p1885_p2, %p2764_p8 }
  0x6c   : > { %p1888_p9 = pneg %p1887_p0 }
  0x6e   : > { %p1893_p1 = pnand %p1891_p10, %p1888_p9 }
  0x70   : > { %1896 = shalt.err (!%p1893_p1)
}
  0x71   : > { %s1897_s12 = scalar_lea.vmem %s397_s2, 1024  ;;  %p1905_p13 = scmp.lt.s32.totalorder %s397_s2, %s397_s2 }
  0x72   : > { %p1898_p4 = scmp.ne.s32.totalorder %s397_s2, %s1897_s12  ;;  %p1906_p3 = scmp.lt.s32.totalorder %s1897_s12, %s1897_s12 }
  0x74   : > { %p1900_p5 = pnand %p1898_p4, %p2764_p8  ;;  %p1907_p7 = por %p1906_p3, %p1905_p13 }
  0x76   : > { %p1901_p11 = pneg %p1900_p5 }
  0x78   : > { %p1908_p6 = pnand %p1907_p7, %p1901_p11 }
  0x7a   : > { %1911 = shalt.err (!%p1908_p6)
}
  0x7b   : > { %p2765_p2 = scmp.ne.s32.totalorder %s2754_s30, 0  ;;  %s1912_s17 = scalar_lea.hbm %s2701_s9, 1024 }
  0x7c   : > { %p1913_p0 = scmp.ne.s32.totalorder %s2701_s9, %s1912_s17  ;;  %p1919_p10 = scmp.lt.u32.totalorder %s1912_s17, %s2701_s9 }
  0x7d   : > { %1704 = dma.hbm_to_vmem [thread:$0]  (!%p2765_p2), %s2700_s8, 1024, %s397_s2, [#allocation9], %s2763_s20, %s2763_s20, %s2762_s25  }
  0x7e   : > { %p1915_p6 = pnand %p1913_p0, %p2764_p8 }
  0x80   : > { %p1916_p9 = pneg %p1915_p6 }
  0x82   : > { %p1921_p1 = pnand %p1919_p10, %p1916_p9 }
  0x84   : > { %1924 = shalt.err (!%p1921_p1)
}
  0x85   : > { %s1925_s7 = scalar_lea.vmem %s410_s28, 1024  ;;  %p1933_p13 = scmp.lt.s32.totalorder %s410_s28, %s410_s28 }
  0x86   : > { %p1926_p4 = scmp.ne.s32.totalorder %s410_s28, %s1925_s7  ;;  %p1934_p3 = scmp.lt.s32.totalorder %s1925_s7, %s1925_s7 }
  0x88   : > { %p1928_p5 = pnand %p1926_p4, %p2764_p8  ;;  %p1935_p7 = por %p1934_p3, %p1933_p13 }
  0x8a   : > { %p1929_p11 = pneg %p1928_p5 }
  0x8c   : > { %p1936_p12 = pnand %p1935_p7, %p1929_p11 }
  0x8e   : > { %1939 = shalt.err (!%p1936_p12)
}
  0x8f   : > { %1707 = dma.hbm_to_vmem [thread:$0]  (!%p2765_p2), %s2701_s9, 1024, %s410_s28, [#allocation12], %s2763_s20, %s2763_s20, %s2762_s25  }
  0x90   : > { %s2368_s4 = scalar_lea.hbm %s2693_s1, %s2269_s21  ;;  %s445_s30 = scalar_lea.vmem [#allocation2], %s2239_s16 }
  0x91   : > { %s452_s5 = sshll.u32 %s445_s30, 4  ;;  %s2377_s24 = scalar_lea.hbm %s2695_s3, %s2269_s21  ;;  %s2371_s5 = int_to_ptr.vmem [resolvable:$true] %s452_s5 }
  0x92   : > { %s2766_s10 = sand.u32 1, %s2074_s27   ;;  %s1940_s11 = scalar_lea.hbm %s2368_s4, 128 }
  0x93   : > { %s2381_s28 = scalar_lea.sflag [#allocation3], %s2766_s10  ;;  %p1941_p12 = scmp.ne.s32.totalorder %s2368_s4, %s1940_s11 }
  0x94   : > { %p2767_p8 = scmp.ne.s32.totalorder %s2761_s13, 0  ;;  %s1945_s2 = scalar_lea.hbm %s2693_s1, 256 }
  0x95   : > { %p1946_p6 = scmp.lt.u32.totalorder %s2368_s4, %s2693_s1  ;;  %p1947_p9 = scmp.lt.u32.totalorder %s1945_s2, %s1940_s11 }
  0x96   : > { %p1943_p2 = pnand %p1941_p12, %p2767_p8  ;;  %p1949_p1 = scmp.lt.u32.totalorder %s1940_s11, %s2368_s4 }
  0x97   : > { %p1948_p10 = por %p1947_p9, %p1946_p6 }
  0x98   : > { %p1944_p0 = pneg %p1943_p2 }
  0x99   : > { %p1950_p4 = por %p1949_p1, %p1948_p10 }
  0x9b   : > { %p1951_p5 = pnand %p1950_p4, %p1944_p0 }
  0x9d   : > { %1954 = shalt.err (!%p1951_p5)
}
  0x9e   : > { %s1955_s21 = scalar_lea.vmem %s2371_s5, 128  ;;  %s2086_s0 = smov [#allocation2]  }
  0x9f   : > { %p1956_p11 = scmp.ne.s32.totalorder %s2371_s5, %s1955_s21  ;;  %s1960_s30 = sshll.u32 %s2086_s0, 4  ;;  %s1961_s30 = int_to_ptr.vmem [resolvable:$false] %s1960_s30 }
  0xa0   : > { %s1962_s6 = scalar_lea.vmem %s1961_s30, 256  ;;  %p1963_p7 = scmp.lt.s32.totalorder %s2371_s5, %s1961_s30 }
  0xa1   : > { %p1958_p13 = pnand %p1956_p11, %p2767_p8  ;;  %p1964_p12 = scmp.lt.s32.totalorder %s1962_s6, %s1955_s21 }
  0xa3   : > { %p1959_p3 = pneg %p1958_p13  ;;  %p1965_p2 = por %p1964_p12, %p1963_p7 }
  0xa5   : > { %p1966_p6 = pnand %p1965_p2, %p1959_p3 }
  0xa7   : > { %1969 = shalt.err (!%p1966_p6)
}
  0xa8   : > { %p2768_p0 = scmp.ne.s32.totalorder %s2759_s15, 0  ;;  %s487_s17 = scalar_lea.vmem [#allocation7], %s2239_s16 }
  0xa9   : > { %s494_s10 = sshll.u32 %s487_s17, 4  ;;  %s1970_s11 = scalar_lea.hbm %s2377_s24, 128  ;;  %s2409_s10 = int_to_ptr.vmem [resolvable:$true] %s494_s10 }
  0xaa   : > { %1711 = dma.hbm_to_vmem [thread:$0]  (!%p2768_p0), %s2368_s4, 128, %s2371_s5, %s2381_s28, %s2763_s20, %s2763_s20, %s2762_s25  }
  0xab   : > { %p1971_p9 = scmp.ne.s32.totalorder %s2377_s24, %s1970_s11  ;;  %s1975_s2 = scalar_lea.hbm %s2695_s3, 256 }
  0xac   : > { %p1976_p4 = scmp.lt.u32.totalorder %s2377_s24, %s2695_s3  ;;  %p1977_p5 = scmp.lt.u32.totalorder %s1975_s2, %s1970_s11 }
  0xad   : > { %p1973_p10 = pnand %p1971_p9, %p2767_p8  ;;  %p1979_p13 = scmp.lt.u32.totalorder %s1970_s11, %s2377_s24 }
  0xae   : > { %p1978_p11 = por %p1977_p5, %p1976_p4 }
  0xaf   : > { %p1974_p1 = pneg %p1973_p10 }
  0xb0   : > { %p1980_p3 = por %p1979_p13, %p1978_p11 }
  0xb2   : > { %p1981_p7 = pnand %p1980_p3, %p1974_p1 }
  0xb4   : > { %1984 = shalt.err (!%p1981_p7)
}
  0xb5   : > { %s1985_s16 = scalar_lea.vmem %s2409_s10, 128  ;;  %s2087_s4 = smov [#allocation7]  }
  0xb6   : > { %p1986_p12 = scmp.ne.s32.totalorder %s2409_s10, %s1985_s16  ;;  %s1990_s5 = sshll.u32 %s2087_s4, 4  ;;  %s1991_s5 = int_to_ptr.vmem [resolvable:$false] %s1990_s5 }
  0xb7   : > { %s1992_s28 = scalar_lea.vmem %s1991_s5, 256  ;;  %p1993_p9 = scmp.lt.s32.totalorder %s2409_s10, %s1991_s5 }
  0xb8   : > { %p1988_p2 = pnand %p1986_p12, %p2767_p8  ;;  %p1994_p10 = scmp.lt.s32.totalorder %s1992_s28, %s1985_s16 }
  0xba   : > { %p1989_p6 = pneg %p1988_p2  ;;  %p1995_p4 = por %p1994_p10, %p1993_p9 }
  0xbc   : > { %p1996_p5 = pnand %p1995_p4, %p1989_p6 }
  0xbe   : > { %1999 = shalt.err (!%p1996_p5)
}
  0xbf   : > { %1717 = dma.hbm_to_vmem [thread:$0]  (!%p2768_p0), %s2377_s24, 128, %s2409_s10, %s2289_s18, %s2763_s20, %s2763_s20, %s2762_s25  }
  0xc0   : > { %p2769_p8 = scmp.ne.s32.totalorder %s2753_s22, 0 }
  0xc1   : > { %s2439_s13 = sand.u32 (!%p2769_p8), 1, %s2070_s26   ;;  %p2770_p1 = scmp.ne.s32.totalorder (!%p2769_p8), %s2748_s19, 0 }
  0xc2   : > { %524 = sbr.rel (%p2769_p8) target bundleno = 903 (0x387), region = 72  ;;  %s2442_s21 = sshll.u32 (!%p2769_p8), %s2439_s13, 3 }
  0xc3   : > { %s527_s15 = scalar_lea.sflag (!%p2769_p8), [#allocation3], %s2439_s13  ;;  %s530_s0 = scalar_lea.vmem (!%p2769_p8), [#allocation2], %s2442_s21 }
  0xc9   : > { %2045 = dma.done.wait (%p2770_p1), %s527_s15, 128  }
  0xca   : > { %2047 = vsyncadd (%p2770_p1), %s527_s15, 4294967168  ;;  %s535_s22 = sand.u32 1, %s2183_s29   ;;  %s539_s25 = scalar_lea.vmem [#allocation5], %s2442_s21 }
  0xcb   : > { %s536_s18 = scalar_lea.sflag [#allocation6], %s535_s22 }
  0xcc   : > { %2049 = dma.done.wait (%p2770_p1), %s536_s18, 256  }
  0xcd   : > { %2051 = vsyncadd (%p2770_p1), %s536_s18, 4294967040  ;;  %s548_s20 = scalar_lea.vmem [#allocation7], %s2442_s21  ;;  %p2771_p0 = scmp.eq.s32.totalorder %s2183_s29, 0 }
  0xcf   : > { %2053 = dma.done.wait (%p2771_p0), [#allocation9], 2048   ;;  %p2772_p11 = pmov %p2771_p0 }
  0xd0   : > { %p2773_p13 = pmov %p2771_p0 }
  0xd1   : > { %2055 = vsyncadd (%p2772_p11), [#allocation9], 4294965248 }
  0xd2   : > { %2057 = dma.done.wait (%p2773_p13), [#allocation12], 1024   ;;  %p2774_p3 = pmov %p2771_p0 }
  0xd3   : > { %v2088_v0 = vmov 0.0   ;;  %vm2089_vm0 = vmmov 0   ;;  %v1772_v1 = vld [vmem:[#allocation11] sm:$0xff]   ;;  %v1774_v3 = vld [vmem:[#allocation11 + $0x8] sm:$0xff]   ;;  %v1776_v5 = vld [vmem:[#allocation11 + $0x10] sm:$0xff]   ;;  %s1510_s19 = sshll.u32 %s2183_s29, 1  ;;  %v653_v62 = vlaneseq }
  0xd4   : > { %2059 = vsyncadd (%p2774_p3), [#allocation12], 4294966272  ;;  %1598 = vmatprep.subr.bf16.mxu0 %v2088_v0  ;;  %1618 = vmatprep.subr.bf16.mxu1 %v2088_v0  ;;  %v1773_v2 = vld [vmem:[#allocation10] sm:$0xff]   ;;  %v1775_v4 = vld [vmem:[#allocation10 + $0x8] sm:$0xff]   ;;  %p629_p7 = scmp.lt.s32.totalorder %s1510_s19, 3  ;;  %s2775_s6 = sld [smem:[#allocation29_spill]] }
  0xd5   : > { %1634 = vmatprep.mubr.msk.bf16.mxu1 %vm2089_vm0, %v2088_v0  ;;  %1614 = vmatprep.mubr.msk.bf16.mxu0 %vm2089_vm0, %v2088_v0  ;;  %v1777_v6 = vld [vmem:[#allocation10 + $0x10] sm:$0xff]   ;;  %v1778_v7 = vld [vmem:[#allocation11 + $0x18] sm:$0xff]   ;;  %v1780_v9 = vld [vmem:[#allocation11 + $0x20] sm:$0xff]   ;;  %s2776_s14 = sld [smem:[#allocation25_spill]]  ;;  %v2090_v37 = vmov 0   ;;  %s2777_s11 = sld [smem:[#allocation27_spill]] }
  0xd6   : > { %1599 = vmatpush3.bf16.msra.mxu0 %v1772_v1  ;;  %1619 = vmatpush3.bf16.msra.mxu1 %v1773_v2  ;;  %v1779_v8 = vld [vmem:[#allocation10 + $0x18] sm:$0xff]   ;;  %v1781_v10 = vld [vmem:[#allocation10 + $0x20] sm:$0xff]   ;;  %v1782_v11 = vld [vmem:[#allocation11 + $0x28] sm:$0xff]   ;;  %s2804_s19 = smov (!%p629_p7, %s1510_s19), 3  ;;  %s2778_s12 = sld [smem:[#allocation28_spill]]  ;;  %v656_v63 = vshrl.u32 %v653_v62, 7 }
  0xd7   : > { %1600 = vmatprep.subr.bf16.mxu0 %v2088_v0  ;;  %1620 = vmatprep.subr.bf16.mxu1 %v2088_v0  ;;  %v1783_v12 = vld [vmem:[#allocation10 + $0x28] sm:$0xff]   ;;  %v1784_v13 = vld [vmem:[#allocation11 + $0x30] sm:$0xff]   ;;  %v1786_v15 = vld [vmem:[#allocation11 + $0x38] sm:$0xff]   ;;  %s1511_s17 = sshll.u32 %s2804_s19, 2  ;;  %v654_v1 = vand.u32 127, %v653_v62  ;;  %s2783_s5 = sld [smem:[#allocation33_spill]] }
  0xd8   : > { %v1785_v14 = vld [vmem:[#allocation10 + $0x30] sm:$0xff]   ;;  %v1787_v16 = vld [vmem:[#allocation10 + $0x38] sm:$0xff]   ;;  %v1788_v17 = vld [vmem:[%s539_s25] sm:$0xff]   ;;  %1771 = vset.pattern.permute.xlu1 %v2090_v37  ;;  %1770 = vset.pattern.permute.xlu0 %v2090_v37  ;;  %v657_v2 = vadd.s32 8, %v656_v63  ;;  %s2784_s25 = sld [smem:[#allocation31_spill]]  ;;  %s2785_s30 = sld [smem:[#allocation32_spill]] }
  0xd9   : > { %v1789_v18 = vld [vmem:[%s548_s20] sm:$0xff]   ;;  %v1791_v20 = vld [vmem:[#allocation8] sm:$0xff]   ;;  %v1793_v22 = vld [vmem:[#allocation8 + $0x8] sm:$0xff]   ;;  %vm663_vm2 = vcmp.lt.s32.totalorder %v654_v1, 32  ;;  %s627_s10 = scalar_lea.vmem [#allocation13], %s2442_s21  ;;  %s2791_s2 = sld [smem:[#allocation34_spill]] }
  0xda   : > { %1601 = vmatpush3.bf16.msra.mxu0 %v1774_v3  ;;  %1621 = vmatpush3.bf16.msra.mxu1 %v1775_v4  ;;  %v1790_v19 = vld [vmem:[%s2775_s6] sm:$0xff]   ;;  %v1792_v21 = vld [vmem:[%s2775_s6 + $0x8] sm:$0xff]   ;;  %v1794_v23 = vld [vmem:[%s2775_s6 + $0x10] sm:$0xff]   ;;  %v658_v3 = vsub.s32 %v654_v1, %v656_v63  ;;  %v659_v4 = vsub.s32 %v654_v1, %v657_v2 }
  0xdb   : > { %1602 = vmatprep.subr.bf16.mxu0 %v2088_v0  ;;  %1622 = vmatprep.subr.bf16.mxu1 %v2088_v0  ;;  %s2501_s7 = scalar_lea.vmem %s2776_s14, %s1511_s17  ;;  %v1795_v24 = vld [vmem:[#allocation8 + $0x10] sm:$0xff]   ;;  %v1796_v25 = vld [vmem:[%s2775_s6 + $0x18] sm:$0xff]   ;;  %v1797_v26 = vld [vmem:[#allocation8 + $0x18] sm:$0xff]   ;;  %s1556_s17 = sshll.u32 %s2183_s29, 7 }
  0xdc   : > { %v1798_v27 = vld [vmem:[%s2775_s6 + $0x20] sm:$0xff]   ;;  %v1799_v28 = vld [vmem:[#allocation8 + $0x20] sm:$0xff]   ;;  %v1800_v29 = vld [vmem:[%s2775_s6 + $0x28] sm:$0xff]  }
  0xdd   : > { %v1801_v30 = vld [vmem:[#allocation8 + $0x28] sm:$0xff]   ;;  %v1802_v31 = vld [vmem:[%s2775_s6 + $0x30] sm:$0xff]   ;;  %v1803_v32 = vld [vmem:[#allocation8 + $0x30] sm:$0xff]  }
  0xde   : > { %1603 = vmatpush3.bf16.msra.mxu0 %v1776_v5  ;;  %1623 = vmatpush3.bf16.msra.mxu1 %v1777_v6  ;;  %v1804_v33 = vld [vmem:[%s2775_s6 + $0x38] sm:$0xff]   ;;  %v1805_v34 = vld [vmem:[#allocation8 + $0x38] sm:$0xff]   ;;  %v1806_v35 = vld [vmem:[%s2501_s7] sm:$0xff]  }
  0xdf   : > { %1604 = vmatprep.subr.bf16.mxu0 %v2088_v0  ;;  %1624 = vmatprep.subr.bf16.mxu1 %v2088_v0  ;;  %v1807_v36 = vld [vmem:[%s530_s0] sm:$0xff]   ;;  %s1513_s0 = sshll.u32 %s2804_s19, 3  ;;  %s1516_s19 = sshll.u32 %s2183_s29, 4 }
  0xe0   : > { %s641_s14 = scalar_lea.vmem %s2777_s11, %s1513_s0  ;;  %s647_s23 = scalar_lea.vmem %s2778_s12, %s1513_s0  ;;  %v660_v5 = vstv %s1516_s19 }
  0xe1   : > { %v780_v57 = vld [vmem:[%s641_s14 + $0x8] sm:$0xff]  ;;  %v937_v58 = vld [vmem:[%s647_s23] sm:$0xff]  ;;  %vm661_vm1 = vcmp.ne.s32.totalorder %v658_v3, %v660_v5  ;;  %vm662_vm3 = vcmp.ne.s32.totalorder %v659_v4, %v660_v5  ;;  %s2790_s0 = sld [smem:[#allocation23_spill]]  ;;  %s1309_s11 = sshll.u32 %s627_s10, 4  ;;  %s2650_s11 = int_to_ptr.vmem [resolvable:$true] %s1309_s11 }
  0xe2   : > { %1605 = vmatpush3.bf16.msra.mxu0 %v1778_v7  ;;  %1625 = vmatpush3.bf16.msra.mxu1 %v1779_v8  ;;  %v779_v59 = vld [vmem:[%s641_s14] sm:$0xff]  ;;  %v938_v61 = vld [vmem:[%s647_s23 + $0x8] sm:$0xff]  ;;  %vm2566_vm4 = vmand %vm661_vm1, %vm663_vm2  ;;  %s2648_s12 = scalar_lea.hbm %s2791_s2, %s1556_s17  ;;  %s1296_s23 = scalar_lea.sflag [#allocation4], %s2439_s13 }
  0xe3   : > { %1606 = vmatprep.subr.bf16.mxu0 %v2088_v0  ;;  %1626 = vmatprep.subr.bf16.mxu1 %v2088_v0  ;;  %vm2570_vm5 = vmand %vm662_vm3, %vm663_vm2  ;;  %v806_v8 = vld [vmem:[%s2783_s5] sm:$0x3]  ;;  %s2000_s19 = scalar_lea.vmem %s2650_s11, 128  ;;  %s2091_s29 = smov [#allocation13]  }
  0xe4   : > { %vm810_vm6 = vmpackc.low %vm2566_vm4, %vm2566_vm4  ;;  %vm808_vm8 = vnez %v806_v8  ;;  %p2001_p12 = scmp.ne.s32.totalorder %s2650_s11, %s2000_s19  ;;  %s2004_s21 = sshll.u32 %s2091_s29, 4  ;;  %s2005_s21 = int_to_ptr.vmem [resolvable:$false] %s2004_s21 }
  0xe5   : > { %vm812_vm7 = vmpackc.low %vm2570_vm5, %vm2570_vm5  ;;  %s2006_s16 = scalar_lea.vmem %s2005_s21, 256  ;;  %p2007_p10 = scmp.lt.s32.totalorder %s2650_s11, %s2005_s21 }
  0xe6   : > { %1607 = vmatpush3.bf16.msra.mxu0 %v1780_v9  ;;  %1627 = vmatpush3.bf16.msra.mxu1 %v1781_v10  ;;  %vm811_vm9 = vmpackc.even %vm810_vm6, %vm810_vm6  ;;  %v807_v10 = vld [vmem:[%s2783_s5 + $0x2] sm:$0x3]  ;;  %p2008_p4 = scmp.lt.s32.totalorder %s2006_s16, %s2000_s19 }
  0xe7   : > { %1608 = vmatprep.subr.bf16.mxu0 %v2088_v0  ;;  %1628 = vmatprep.subr.bf16.mxu1 %v2088_v0  ;;  %vm813_vm10 = vmpackc.even %vm812_vm7, %vm812_vm7  ;;  %vm809_vm12 = vnez %v807_v10  ;;  %p2792_p2 = scmp.ne.s32.totalorder %s2790_s0, 0 }
  0xe8   : > { %vm814_vm11 = vmand %vm808_vm8, %vm811_vm9  ;;  %p2009_p5 = por %p2008_p4, %p2007_p10 }
  0xe9   : > { %vm815_vm14 = vmand %vm809_vm12, %vm813_vm10  ;;  %p2002_p6 = pnand %p2001_p12, %p2792_p2 }
  0xea   : > { %1609 = vmatpush3.bf16.msra.mxu0 %v1782_v11  ;;  %1629 = vmatpush3.bf16.msra.mxu1 %v1783_v12 }
  0xeb   : > { %1610 = vmatprep.subr.bf16.mxu0 %v2088_v0  ;;  %1630 = vmatprep.subr.bf16.mxu1 %v2088_v0  ;;  %p2003_p9 = pneg %p2002_p6 }
  0xed   : > { %p2010_p8 = pnand %p2009_p5, %p2003_p9 }
  0xee   : > { %1611 = vmatpush3.bf16.msra.mxu0 %v1784_v13  ;;  %1631 = vmatpush3.bf16.msra.mxu1 %v1785_v14 }
  0xef   : > { %1612 = vmatprep.subr.bf16.mxu0 %v2088_v0  ;;  %1632 = vmatprep.subr.bf16.mxu1 %v2088_v0 }
  0xf2   : > { %1613 = vmatpush3.bf16.msra.mxu0 %v1786_v15  ;;  %1633 = vmatpush3.bf16.msra.mxu1 %v1787_v16 }
  0xf3   : > { %1638 = vmatprep.subr.bf16.mxu0 %v2088_v0  ;;  %1658 = vmatprep.subr.bf16.mxu1 %v2088_v0 }
  0xf5   : > { %1615 = vmatmul.mubr.bf16.vlgmr.msra.gmra.mrb[0].mxu0 %v1789_v18  ;;  %1635 = vmatmul.mubr.bf16.vlgmr.msra.gmra.mrb[0].mxu1 %v1788_v17  ;;  %v1526_v17 = vld [vmem:[%s2784_s25] ss:$0 sm:$0xff] }
  0xf6   : > { %1639 = vmatpush3.bf16.msra.mxu0 %v1790_v19  ;;  %1659 = vmatpush3.bf16.msra.mxu1 %v1791_v20  ;;  %v816_v20 = vsel %vm814_vm11, 16843009, %v2090_v37 }
  0xf7   : > { %1640 = vmatprep.subr.bf16.mxu0 %v2088_v0  ;;  %1660 = vmatprep.subr.bf16.mxu1 %v2088_v0 }
  0xf8   : > { %1654 = vmatprep.mubr.msk.bf16.mxu0 %vm2089_vm0, %v2088_v0  ;;  %1674 = vmatprep.mubr.msk.bf16.mxu1 %vm2089_vm0, %v2088_v0 }
  0xfa   : > { %1641 = vmatpush3.bf16.msra.mxu0 %v1792_v21  ;;  %1661 = vmatpush3.bf16.msra.mxu1 %v1793_v22  ;;  %v1536_v21 = vld [vmem:[%s2785_s30] ss:$0 sm:$0xff] }
  0xfb   : > { %1642 = vmatprep.subr.bf16.mxu0 %v2088_v0  ;;  %1662 = vmatprep.subr.bf16.mxu1 %v2088_v0 }
  0xfe   : > { %1643 = vmatpush3.bf16.msra.mxu0 %v1794_v23  ;;  %1663 = vmatpush3.bf16.msra.mxu1 %v1795_v24 }
  0xff   : > { %1644 = vmatprep.subr.bf16.mxu0 %v2088_v0  ;;  %1664 = vmatprep.subr.bf16.mxu1 %v2088_v0 }
 0x102   : > { %1645 = vmatpush3.bf16.msra.mxu0 %v1796_v25  ;;  %1665 = vmatpush3.bf16.msra.mxu1 %v1797_v26  ;;  %v818_v25 = vunpack.c.0.s8 %v816_v20  ;;  %v817_v26 = vsel %vm815_vm14, 16843009, %v2090_v37 }
 0x103   : > { %1646 = vmatprep.subr.bf16.mxu0 %v2088_v0  ;;  %1666 = vmatprep.subr.bf16.mxu1 %v2088_v0 }
 0x104   : > { %vm820_vm10 = vcmp.ne.s32.totalorder %v818_v25, 0 }
 0x106   : > { %1647 = vmatpush3.bf16.msra.mxu0 %v1798_v27  ;;  %1667 = vmatpush3.bf16.msra.mxu1 %v1799_v28  ;;  %v819_v28 = vunpack.c.0.s8 %v817_v26 }
 0x107   : > { %1648 = vmatprep.subr.bf16.mxu0 %v2088_v0  ;;  %1668 = vmatprep.subr.bf16.mxu1 %v2088_v0 }
 0x108   : > { %vm821_vm14 = vcmp.ne.s32.totalorder %v819_v28, 0 }
 0x10a   : > { %1649 = vmatpush3.bf16.msra.mxu0 %v1800_v29  ;;  %1669 = vmatpush3.bf16.msra.mxu1 %v1801_v30 }
 0x10b   : > { %1650 = vmatprep.subr.bf16.mxu0 %v2088_v0  ;;  %1670 = vmatprep.subr.bf16.mxu1 %v2088_v0 }
 0x10e   : > { %1651 = vmatpush3.bf16.msra.mxu0 %v1802_v31  ;;  %1671 = vmatpush3.bf16.msra.mxu1 %v1803_v32 }
 0x10f   : > { %1652 = vmatprep.subr.bf16.mxu0 %v2088_v0  ;;  %1672 = vmatprep.subr.bf16.mxu1 %v2088_v0 }
 0x112   : > { %1653 = vmatpush3.bf16.msra.mxu0 %v1804_v33  ;;  %1673 = vmatpush3.bf16.msra.mxu1 %v1805_v34 }
 0x115   : > { %1655 = vmatmul.mubr.bf16.vlgmr.msra.gmra.mrb[4].mxu0 %v1806_v35  ;;  %1675 = vmatmul.mubr.bf16.vlgmr.msra.gmra.mrb[4].mxu1 %v1807_v36 }
 0x1c8   : > { %v2547_v38 = vpop.f32.mrb[0].mxu0  ;;  %v2549_v39 = vpop.f32.mrb[0].mxu1 }
 0x1c9   : > { %v1616_v40 = vpop.f32.mrb[1].mxu0  ;;  %v1636_v41 = vpop.f32.mrb[1].mxu1  ;;  %vm958_vm1 = vcmp.lt.f32.partialorder %v1536_v21, %v2549_v39  ;;  %vm800_vm7 = vcmp.lt.f32.partialorder %v1526_v17, %v2547_v38 }
 0x1ca   : > { %v2551_v42 = vpop.f32.mrb[2].mxu0  ;;  %v2553_v43 = vpop.f32.mrb[2].mxu1 }
 0x1cb   : > { %v1617_v44 = vpop.f32.mrb[3].mxu0  ;;  %v1637_v45 = vpop.f32.mrb[3].mxu1  ;;  %vm801_vm15 = vcmp.lt.f32.partialorder %v1526_v17, %v2551_v42 }
 0x1e8   : > { %v1070_v46 = vpop.f32.mrb[4].mxu0  ;;  %v1207_v48 = vpop.f32.mrb[4].mxu1 }
 0x1e9   : > { %v1077_v47 = vmul.f32 14.285714, %v1070_v46  ;;  %v1656_v49 = vpop.f32.mrb[5].mxu0  ;;  %v1214_v50 = vmul.f32 14.285714, %v1207_v48  ;;  %v1676_v51 = vpop.f32.mrb[5].mxu1 }
 0x1ea   : > { %v1073_v52 = vpop.f32.mrb[6].mxu0  ;;  %v1210_v53 = vpop.f32.mrb[6].mxu1 }
 0x1eb   : > { %1079 = vmax.xlane.f32.xlu0 %v1077_v47  ;;  %v1078_v54 = vmul.f32 14.285714, %v1073_v52  ;;  %v1657_v55 = vpop.f32.mrb[7].mxu0  ;;  %1216 = vmax.xlane.f32.xlu1 %v1214_v50  ;;  %v1677_v56 = vpop.f32.mrb[7].mxu1  ;;  %v2562_v60 = vmul.f32 14.285714, %v1210_v53 }
 0x1ef   : > { %1081 = vmax.xlane.f32.xlu0 %v1078_v54 }
 0x1fc   : > { %788 = vperm.xlu1 %1771, %v780_v57  }
 0x200   : > { %941 = vperm.xlu1 %1771, %v937_v58  }
 0x205   : > { %783 = vperm.xlu0 %1770, %v779_v59  }
 0x224   : > { %1218 = vmax.xlane.f32.xlu1 %v2562_v60 }
 0x235   : > { %946 = vperm.xlu1 %1771, %v938_v61  }
 0x278   : > { %v1080_v9 = vpop.xlane.xlu0 %1079  ;;  %v1217_v11 = vpop.xlane.xlu1 %1216 }
 0x279   : > { %v1083_v12 = vsub.f32 %v1077_v47, %v1080_v9  ;;  %v1220_v13 = vsub.f32 %v1214_v50, %v1217_v11 }
 0x27b   : > { %v1085_v14 = vmul.f32 1.442695, %v1083_v12  ;;  %v1222_v15 = vmul.f32 1.442695, %v1220_v13 }
 0x27c   : > { %v1082_v16 = vpop.xlane.xlu0 %1081  ;;  %v789_v18 = vpop.permute.xlu1 %788 }
 0x27d   : > { %1808 = vpow2.f32 %v1085_v14  ;;  %v1084_v19 = vsub.f32 %v1078_v54, %v1082_v16  ;;  %vm792_vm13 = vcmp.lt.f32.partialorder %v789_v18, %v2551_v42 }
 0x27e   : > { %1810 = vpow2.f32 %v1222_v15  ;;  %vm2595_vm0 = vmor %vm792_vm13, %vm801_vm15 }
 0x27f   : > { %v1087_v22 = vmul.f32 1.442695, %v1084_v19  ;;  %vm805_vm6 = vmand %vm2595_vm0, %vm2570_vm5 }
 0x280   : > { %v942_v24 = vpop.permute.xlu1 %941  ;;  %vm2619_vm15 = vmor %vm805_vm6, %vm821_vm14  ;;  %v1239_v46 = vsel %vm805_vm6, 1.0, %v2088_v0 }
 0x281   : > { %1812 = vpow2.f32 %v1087_v22  ;;  %vm949_vm2 = vcmp.lt.f32.partialorder %v942_v24, %v2549_v39  ;;  %v1252_v39 = vadd.f32 %v1220_v13, %v1083_v12 }
 0x282   : > { %vm960_vm3 = vmor %vm949_vm2, %vm958_vm1 }
 0x283   : > { %vm962_vm8 = vmand %vm960_vm3, %vm2566_vm4 }
 0x284   : > { %v784_v27 = vpop.permute.xlu0 %783  ;;  %v1240_v31 = vsel %vm962_vm8, 0.5, %v2088_v0 }
 0x285   : > { %vm791_vm9 = vcmp.lt.f32.partialorder %v784_v27, %v2547_v38 }
 0x286   : > { %vm802_vm11 = vmor %vm791_vm9, %vm800_vm7 }
 0x287   : > { %v1809_v29 = vpop.eup %1808  ;;  %vm804_vm12 = vmand %vm802_vm11, %vm2566_vm4  ;;  %vm959_vm4 = vcmp.lt.f32.partialorder %v1536_v21, %v2553_v43 }
 0x288   : > { %vm822_vm13 = vmor %vm804_vm12, %vm820_vm10  ;;  %v1238_v30 = vsel %vm804_vm12, 1.0, %v2088_v0  ;;  %v1811_v34 = vpop.eup %1810 }
 0x289   : > { %v1089_v32 = vsel %vm822_vm13, %v1809_v29, 0.0  ;;  %v1242_v33 = vadd.f32 %v1240_v31, %v1238_v30  ;;  %v1226_v38 = vsel %vm822_vm13, %v1811_v34, 0.0 }
 0x28a   : > { %1091 = vadd.xlane.f32.xlu1 %v1089_v32 }
 0x28b   : > { %v1813_v35 = vpop.eup %1812  ;;  %v1254_v40 = vmul.f32 %v1252_v39, %v1242_v33 }
 0x28c   : > { %v1090_v37 = vsel %vm2619_vm15, %v1813_v35, 0.0 }
 0x28d   : > { %1093 = vadd.xlane.f32.xlu0 %v1090_v37 }
 0x28e   : > { %1228 = vadd.xlane.f32.xlu1 %v1226_v38 }
 0x291   : > { %1248 = vadd.xlane.f32.xlu0 %v1242_v33 }
 0x292   : > { %1244 = vadd.xlane.f32.xlu1 %v1238_v30 }
 0x295   : > { %1256 = vadd.xlane.f32.xlu0 %v1254_v40 }
 0x2b1   : > { %v1219_v41 = vpop.xlane.xlu1 %1218 }
 0x2b2   : > { %v1221_v42 = vsub.f32 %v2562_v60, %v1219_v41 }
 0x2b4   : > { %v1224_v44 = vmul.f32 1.442695, %v1221_v42  ;;  %v1253_v48 = vadd.f32 %v1221_v42, %v1084_v19 }
 0x2b5   : > { %v947_v45 = vpop.permute.xlu1 %946 }
 0x2b6   : > { %1814 = vpow2.f32 %v1224_v44  ;;  %vm950_vm1 = vcmp.lt.f32.partialorder %v947_v45, %v2553_v43 }
 0x2b7   : > { %vm961_vm2 = vmor %vm950_vm1, %vm959_vm4 }
 0x2b8   : > { %vm963_vm3 = vmand %vm961_vm2, %vm2570_vm5 }
 0x2b9   : > { %v1241_v47 = vsel %vm963_vm3, 0.5, %v2088_v0 }
 0x2ba   : > { %v1243_v49 = vadd.f32 %v1241_v47, %v1239_v46 }
 0x2bc   : > { %v1255_v50 = vmul.f32 %v1253_v48, %v1243_v49 }
 0x2c0   : > { %v1815_v51 = vpop.eup %1814 }
 0x2c1   : > { %v1227_v43 = vsel %vm2619_vm15, %v1815_v51, 0.0 }
 0x2c2   : > { %1230 = vadd.xlane.f32.xlu1 %v1227_v43 }
 0x2c6   : > { %1246 = vadd.xlane.f32.xlu1 %v1239_v46 }
 0x2ca   : > { %1250 = vadd.xlane.f32.xlu1 %v1243_v49 }
 0x2ce   : > { %1258 = vadd.xlane.f32.xlu1 %v1255_v50 }
 0x317   : > { %v1092_v52 = vpop.xlane.xlu1 %1091 }
 0x318   : > { %v1095_v55 = vmax.f32 %v1092_v52, 1e-37 }
 0x31a   : > { %v1094_v56 = vpop.xlane.xlu0 %1093 }
 0x31b   : > { %v1229_v53 = vpop.xlane.xlu1 %1228  ;;  %v1096_v0 = vmax.f32 %v1094_v56, 1e-37 }
 0x31c   : > { %v1232_v54 = vmax.f32 %v1229_v53, 1e-37 }
 0x31e   : > { %1816 = vlog2.f32 %v1232_v54  ;;  %v1249_v2 = vpop.xlane.xlu0 %1248 }
 0x31f   : > { %1818 = vlog2.f32 %v1095_v55  ;;  %v1245_v57 = vpop.xlane.xlu1 %1244 }
 0x320   : > { %1820 = vlog2.f32 %v1096_v0  ;;  %vm1266_vm5 = vcmp.gt.f32.partialorder %v1245_v57, 0.0 }
 0x321   : > { %v1277_v4 = vsel %vm1266_vm5, %v1249_v2, 0.0 }
 0x322   : > { %v1257_v17 = vpop.xlane.xlu0 %1256 }
 0x328   : > { %v1817_v60 = vpop.eup %1816 }
 0x329   : > { %v1819_v62 = vpop.eup %1818  ;;  %v1235_v63 = vmul.f32 0.6931472, %v1817_v60 }
 0x32a   : > { %v1098_v1 = vmul.f32 0.6931472, %v1819_v62  ;;  %v1821_v8 = vpop.eup %1820 }
 0x32b   : > { %v1100_v11 = vmul.f32 0.6931472, %v1821_v8 }
 0x32c   : > { %v1260_v6 = vadd.f32 %v1235_v63, %v1098_v1 }
 0x32e   : > { %v1262_v12 = vmul.f32 %v1260_v6, %v1249_v2 }
 0x330   : > { %v1264_v18 = vsub.f32 %v1257_v17, %v1262_v12 }
 0x332   : > { %v1268_v24 = vsel %vm1266_vm5, %v1264_v18, 0.0 }
 0x34f   : > { %v1231_v58 = vpop.xlane.xlu1 %1230 }
 0x350   : > { %v1233_v59 = vmax.f32 %v1231_v58, 1e-37 }
 0x352   : > { %1822 = vlog2.f32 %v1233_v59 }
 0x353   : > { %v1247_v61 = vpop.xlane.xlu1 %1246 }
 0x354   : > { %vm1267_vm0 = vcmp.gt.f32.partialorder %v1247_v61, 0.0 }
 0x357   : > { %v1251_v3 = vpop.xlane.xlu1 %1250 }
 0x358   : > { %v1278_v5 = vsel %vm1267_vm0, %v1251_v3, 0.0 }
 0x359   : > { %v1279_v7 = vadd.f32 %v1278_v5, %v1277_v4 }
 0x35b   : > { %v1280_v9 = vrot.slane %v1279_v7, 4  ;;  %v1259_v21 = vpop.xlane.xlu1 %1258 }
 0x35c   : > { %v1823_v10 = vpop.eup %1822 }
 0x35d   : > { %v1237_v13 = vmul.f32 0.6931472, %v1823_v10  ;;  %v1281_v14 = vadd.f32 %v1280_v9, %v1279_v7 }
 0x35f   : > { %v1261_v15 = vadd.f32 %v1237_v13, %v1100_v11  ;;  %v1282_v16 = vrot.slane %v1281_v14, 2 }
 0x361   : > { %v1263_v19 = vmul.f32 %v1261_v15, %v1251_v3  ;;  %v1283_v20 = vadd.f32 %v1282_v16, %v1281_v14 }
 0x363   : > { %v1284_v22 = vrot.slane %v1283_v20, 1  ;;  %v1265_v23 = vsub.f32 %v1259_v21, %v1263_v19 }
 0x365   : > { %v1285_v25 = vadd.f32 %v1284_v22, %v1283_v20  ;;  %v1269_v26 = vsel %vm1267_vm0, %v1265_v23, 0.0 }
 0x366   : > { %v1270_v27 = vadd.f32 %v1269_v26, %v1268_v24 }
 0x367   : > { %vm1286_vm6 = vcmp.gt.f32.partialorder %v1285_v25, 0.0 }
 0x368   : > { %v1287_v28 = vsel %vm1286_vm6, %v1285_v25, 1.0  ;;  %v1271_v29 = vrot.slane %v1270_v27, 4 }
 0x369   : > { %1824 = vrcp.f32 %v1287_v28 }
 0x36a   : > { %v1272_v30 = vadd.f32 %v1271_v29, %v1270_v27 }
 0x36c   : > { %v1273_v31 = vrot.slane %v1272_v30, 2 }
 0x36e   : > { %v1274_v32 = vadd.f32 %v1273_v31, %v1272_v30 }
 0x370   : > { %v1275_v33 = vrot.slane %v1274_v32, 1 }
 0x372   : > { %v1276_v34 = vadd.f32 %v1275_v33, %v1274_v32 }
 0x373   : > { %v1825_v35 = vpop.eup %1824 }
 0x374   : > { %v1289_v36 = vmul.f32 %v1825_v35, %v1276_v34 }
 0x376   : > { %v1290_v37 = vsel %vm1286_vm6, %v1289_v36, 0.0 }
 0x377   : > { %v1292_v38 = vmul.f32 -1.0, %v1290_v37 }
 0x379   : > { %1294 = vst [vmem:[%s627_s10] sm:$0xff] %v1292_v38 }
 0x37a   : > { %2013 = shalt.err (!%p2010_p8)
}
 0x37b   : > { %s2014_s13 = scalar_lea.hbm %s2648_s12, 128  ;;  %s2018_s15 = scalar_lea.hbm %s2791_s2, 256 }
 0x37c   : > { %p2015_p1 = scmp.ne.s32.totalorder %s2648_s12, %s2014_s13  ;;  %p2019_p13 = scmp.lt.u32.totalorder %s2648_s12, %s2791_s2 }
 0x37d   : > { %p2020_p3 = scmp.lt.u32.totalorder %s2018_s15, %s2014_s13  ;;  %p2022_p12 = scmp.lt.u32.totalorder %s2014_s13, %s2648_s12 }
 0x37e   : > { %p2016_p0 = pnand %p2015_p1, %p2792_p2 }
 0x37f   : > { %p2021_p7 = por %p2020_p3, %p2019_p13 }
 0x380   : > { %p2017_p11 = pneg %p2016_p0 }
 0x381   : > { %p2023_p6 = por %p2022_p12, %p2021_p7 }
 0x383   : > { %p2024_p9 = pnand %p2023_p6, %p2017_p11 }
 0x385   : > { %2027 = shalt.err (!%p2024_p9)
}
 0x386   : > { %1696 = dma.vmem_to_hbm [thread:$0]  (%p2792_p2), %s2650_s11, 128, %s2648_s12, %s1296_s23  }
 0x387 PF: > { %s2793_s25 = sld [smem:[#allocation19_spill]]  ;;  %s2794_s20 = sld [smem:[#allocation24_spill]] }
 0x388   : > { %s2795_s24 = sld [smem:[#allocation20_spill]] }
 0x38d   : > { %s1321_s30 = sand.u32 1, %s2793_s25   ;;  %p2796_p10 = scmp.ne.s32.totalorder %s2794_s20, 0 }
 0x38e   : > { %p2797_p4 = scmp.ge.s32.totalorder %s2795_s24, 2  ;;  %s1322_s17 = scalar_lea.sflag [#allocation4], %s1321_s30 }
 0x390   : > { %p1719_p5 = pnand %p2797_p4, %p2796_p10 }
 0x392   : > { %2061 = dma.done.wait (!%p1719_p5), %s1322_s17, 128  }
 0x393   : > { %2063 = vsyncadd (!%p1719_p5), %s1322_s17, 4294967168  ;;  %s2798_s28 = sld [smem:[#allocation21_spill]]  ;;  %s2799_s10 = sld [smem:[#allocation22_spill]] }
 0x394   : > { %s2800_s25 = smov %s2070_s26  ;;  %s2801_s26 = smov %s2074_s27 }
 0x399   : > { %p31_p8 = scmp.ge.s32.totalorder %s2798_s28, 4   ;;  %s2802_s27 = smov %s2799_s10 }
 0x39b   :  { %33 = sbr.rel (!%p31_p8) target bundleno = 20 (0x14), region = 162 }
 0x3a2   :  { %1327 = vsyncpa [#allocation3], 1 }
 0x3a3   :  { %1329 = vsyncpa [#allocation3 + $0x1], 1 }
 0x3a4   :  { %1330 = vsyncpa [#allocation6], 1 }
 0x3a5   :  { %1332 = vsyncpa [#allocation6 + $0x1], 1 }
 0x3a6   :  { %1333 = vsyncpa [#allocation9], 1 }
 0x3a7   :  { %1334 = vsyncpa [#allocation12], 1 }
 0x3a8   :  { %1335 = vsyncpa [#allocation4], 1 }
 0x3a9   :  { %1337 = vsyncpa [#allocation4 + $0x1], 1 }

// kernel: tpu_custom_call.1
= control target key start
LH: loop header
LB: loop body
LE: loop exit
PB: predicated region body
PF: predicated region fallthrough
CT: control target
= control target key end

     0   :  { %s2692_s0 = inlined_call_operand.vmem [shape: bf16[32,128], index: 0, kind: input, shape index: {}]   ;;  %s2693_s1 = inlined_call_operand.hbm [shape: bf16[32,128], index: 1, kind: input, shape index: {}]   ;;  %s2694_s2 = inlined_call_operand.hbm [shape: bf16[32,128], index: 2, kind: input, shape index: {}]   ;;  %s2695_s3 = inlined_call_operand.hbm [shape: bf16[32,128], index: 3, kind: input, shape index: {}]   ;;  %s2696_s4 = inlined_call_operand.vmem [shape: f32[32,1], index: 4, kind: input, shape index: {}]   ;;  %s2697_s5 = inlined_call_operand.vmem [shape: f32[32,1], index: 5, kind: input, shape index: {}]   ;;  %s2698_s6 = inlined_call_operand.vmem [shape: bf16[128,128], index: 6, kind: input, shape index: {}]   ;;  %s2699_s7 = inlined_call_operand.hbm [shape: bf16[128,128], index: 7, kind: input, shape index: {}]   ;;  %s2700_s8 = inlined_call_operand.hbm [shape: bf16[128,128], index: 8, kind: input, shape index: {}]   ;;  %s2701_s9 = inlined_call_operand.hbm [shape: bf16[128,128], index: 9, kind: input, shape index: {}]   ;;  %s2702_s10 = inlined_call_operand.vmem [shape: f32[1,128], index: 10, kind: input, shape index: {}]   ;;  %s2703_s11 = inlined_call_operand.vmem [shape: f32[1,128], index: 11, kind: input, shape index: {}]   ;;  %s2704_s12 = inlined_call_operand.vmem [shape: s8[16,128], index: 12, kind: input, shape index: {}]   ;;  %s2705_s13 = inlined_call_operand.hbm [shape: f32[16,128], index: 13, kind: output, shape index: {}]  }
   0x1   :  { %2733 = sst [smem:[#allocation25_spill]] %s2692_s0 }
   0x2   :  { %2734 = sst [smem:[#allocation26_spill]] %s2694_s2 }
   0x3   :  { %2735 = sst [smem:[#allocation27_spill]] %s2696_s4 }
   0x4   :  { %2736 = sst [smem:[#allocation28_spill]] %s2697_s5 }
   0x5   :  { %2737 = sst [smem:[#allocation29_spill]] %s2698_s6 }
   0x6   :  { %2738 = sst [smem:[#allocation30_spill]] %s2699_s7 }
   0x7   :  { %2739 = sst [smem:[#allocation31_spill]] %s2702_s10 }
   0x8   :  { %2740 = sst [smem:[#allocation32_spill]] %s2703_s11 }
   0x9   :  { %2741 = sst [smem:[#allocation33_spill]] %s2704_s12 }
   0xa   :  { %2742 = sst [smem:[#allocation34_spill]] %s2705_s13 }
   0xb   :  { %18 = vsyncpa [#allocation3], 0 }
   0xc   :  { %20 = vsyncpa [#allocation3 + $0x1], 0 }
   0xd   :  { %21 = vsyncpa [#allocation6], 0 }
   0xe   :  { %23 = vsyncpa [#allocation6 + $0x1], 0 }
   0xf   :  { %24 = vsyncpa [#allocation9], 0 }
  0x10   :  { %25 = vsyncpa [#allocation12], 0 }
  0x11   :  { %26 = vsyncpa [#allocation4], 0 }
  0x12   :  { %28 = vsyncpa [#allocation4 + $0x1], 0  ;;  %s2162_s25 = smov 0   ;;  %s2164_s26 = smov 0  }
  0x13   :  { %s2166_s27 = smov 0   ;;  %s2168_s28 = smov 0  }
  0x14 LB: > { %2743 = sst [smem:[#allocation19_spill]] %s2066_s25  ;;  %s2183_s29 = sadd.s32 4294967295, %s2078_s28   ;;  %s2078_s28 = sphi %s2168_s28, %s2798_s28   ;;  %s2074_s27 = sphi %s2166_s27, %s2802_s27   ;;  %s2070_s26 = sphi %s2164_s26, %s2801_s26   ;;  %s2066_s25 = sphi %s2162_s25, %s2800_s25  }
  0x15   : > { %2744 = sst [smem:[#allocation20_spill]] %s2078_s28  ;;  %s1487_s30 = sadd.s32 4294967294, %s2078_s28  }
  0x16   : > { %s2187_s14 = sadd.s32 1, %s2078_s28   ;;  %s67_s15 = sadd.s32 1, %s2074_s27 }
  0x17   : > { %2745 = sst [smem:[#allocation21_spill]] %s2187_s14  ;;  %s64_s16 = ssub.s32 %s2078_s28, %s2187_s14 }
  0x18   : > { %p74_p0 = scmp.ne.s32.totalorder %s2074_s27, %s2070_s26  ;;  %p65_p1 = scmp.eq.s32.totalorder %s64_s16, 0 }
  0x19   : > { %p75_p2 = scmp.eq.s32.totalorder %s2078_s28, 0  ;;  %p80_p3 = scmp.ne.s32.totalorder %s2070_s26, %s2066_s25 }
  0x1a   : > { %p2714_p4 = scmp.eq.s32.totalorder %s2183_s29, 0  ;;  %p355_p7 = scmp.eq.s32.totalorder %s2183_s29, 1 }
  0x1b   : > { %s2199_s17 = scalar_select %p65_p1, %s2074_s27, %s67_s15  }
  0x1c   : > { %p2201_p5 = por %p75_p2, %p74_p0  ;;  %p2207_p6 = por %p2714_p4, %p80_p3 }
  0x1d   : > { %2746 = sst [smem:[#allocation22_spill]] %s2199_s17  ;;  %p361_p8 = scmp.eq.s32.totalorder %s1487_s30, 1 }
  0x1e   : > { %s2747_s18 = scalar_select %p2201_p5, 1, 0 }
  0x1f   : > { %s2748_s19 = scalar_select %p2207_p6, 1, 0 }
  0x20   : > { %p1488_p9 = scmp.ge.s32.totalorder %s2078_s28, 1  ;;  %p368_p10 = scmp.lt.s32.totalorder %s2078_s28, 3 }
  0x21   : > { %p2214_p11 = por %p355_p7, %p74_p0  ;;  %p2218_p12 = por %p361_p8, %p80_p3 }
  0x22   : > { %p2222_p13 = pnand %p1488_p9, %p368_p10  ;;  %s2080_s23 = smov [#allocation8]  }
  0x23   : > { %s2749_s20 = scalar_select %p2214_p11, 1, 0 }
  0x24   : > { %s2751_s21 = scalar_select %p2218_p12, 1, 0 }
  0x25   : > { %2750 = sst [smem:[#allocation23_spill]] %s2749_s20  ;;  %p1698_p1 = pneg %p2222_p13 }
  0x26   : > { %2752 = sst [smem:[#allocation24_spill]] %s2751_s21  ;;  %s383_s24 = sshll.u32 %s2080_s23, 4  ;;  %s384_s24 = int_to_ptr.vmem [resolvable:$true] %s383_s24 }
  0x27   : > { %s2753_s22 = scalar_select %p2222_p13, 1, 0 }
  0x28   : > { %p2230_p2 = pnand %p1698_p1, %p2714_p4  ;;  %s2713_s15 = sand.u32 1, %s2074_s27  }
  0x29   : > { %s2239_s16 = sshll.u32 %s2713_s15, 3  ;;  %s2755_s7 = sld [smem:[#allocation30_spill]] }
  0x2a   : > { %s2754_s30 = scalar_select %p2230_p2, 1, 0 }
  0x2b   : > { %p2249_p8 = pneg %p2230_p2 }
  0x2d   : > { %s2756_s23 = scalar_select %p2249_p8, 1, 0 }
  0x2f   : > { %s1826_s21 = scalar_lea.hbm %s2755_s7, 1024 }
  0x30   : > { %p1827_p7 = scmp.ne.s32.totalorder %s2755_s7, %s1826_s21  ;;  %p1833_p1 = scmp.lt.u32.totalorder %s1826_s21, %s2755_s7 }
  0x32   : > { %p1829_p9 = pnand %p2249_p8, %p1827_p7 }
  0x34   : > { %p1830_p10 = pneg %p1829_p9 }
  0x36   : > { %p1835_p0 = pnand %p1833_p1, %p1830_p10 }
  0x38   : > { %1838 = shalt.err (!%p1835_p0)
}
  0x39   : > { %s1839_s14 = scalar_lea.vmem %s384_s24, 1024  ;;  %p1847_p11 = scmp.lt.s32.totalorder %s384_s24, %s384_s24 }
  0x3a   : > { %p1840_p4 = scmp.ne.s32.totalorder %s384_s24, %s1839_s14  ;;  %p1848_p6 = scmp.lt.s32.totalorder %s1839_s14, %s1839_s14 }
  0x3c   : > { %p1842_p3 = pnand %p1840_p4, %p2249_p8  ;;  %p1849_p13 = por %p1848_p6, %p1847_p11 }
  0x3e   : > { %p1843_p12 = pneg %p1842_p3 }
  0x40   : > { %p1850_p5 = pnand %p1849_p13, %p1843_p12 }
  0x42   : > { %1853 = shalt.err (!%p1850_p5)
}
  0x43   : > { %s2719_s13 = smov 64   ;;  %s2721_s25 = smov 4  }
  0x44   : > { %1701 = dma.hbm_to_vmem [thread:$0]  (!%p2230_p2), %s2755_s7, 1024, %s384_s24, [#allocation9], %s2719_s13, %s2719_s13, %s2721_s25  }
  0x45   : > { %s2269_s21 = sshll.u32 %s2078_s28, 7  ;;  %p2757_p4 = scmp.ne.s32.totalorder %s2747_s18, 0 }
  0x46   : > { %p2758_p5 = scmp.lt.s32.totalorder %s2078_s28, 2  ;;  %s462_s14 = sand.u32 1, %s2078_s28  }
  0x47   : > { %s2760_s2 = sld [smem:[#allocation26_spill]]  ;;  %s466_s24 = scalar_lea.vmem [#allocation5], %s2239_s16 }
  0x48   : > { %p2275_p6 = pnand %p2758_p5, %p2757_p4  ;;  %s473_s17 = sshll.u32 %s466_s24, 4  ;;  %s2287_s17 = int_to_ptr.vmem [resolvable:$true] %s473_s17 }
  0x49   : > { %s2289_s18 = scalar_lea.sflag [#allocation6], %s462_s14 }
  0x4a   : > { %s2759_s15 = scalar_select %p2275_p6, 1, 0 }
  0x4b   : > { %p2295_p12 = pneg %p2275_p6 }
  0x4d   : > { %s2284_s12 = scalar_lea.hbm %s2760_s2, %s2269_s21  ;;  %s1859_s25 = scalar_lea.hbm %s2760_s2, 256 }
  0x4e   : > { %s1854_s20 = scalar_lea.hbm %s2284_s12, 128  ;;  %p1860_p3 = scmp.lt.u32.totalorder %s2284_s12, %s2760_s2 }
  0x4f   : > { %p1855_p11 = scmp.ne.s32.totalorder %s2284_s12, %s1854_s20  ;;  %p1861_p7 = scmp.lt.u32.totalorder %s1859_s25, %s1854_s20 }
  0x50   : > { %s2761_s13 = scalar_select %p2295_p12, 1, 0 }
  0x51   : > { %p1857_p13 = pnand %p2295_p12, %p1855_p11  ;;  %p1862_p9 = por %p1861_p7, %p1860_p3 }
  0x52   : > { %p1863_p10 = scmp.lt.u32.totalorder %s1854_s20, %s2284_s12 }
  0x53   : > { %p1858_p0 = pneg %p1857_p13 }
  0x54   : > { %p1864_p1 = por %p1863_p10, %p1862_p9 }
  0x56   : > { %p1865_p4 = pnand %p1864_p1, %p1858_p0 }
  0x58   : > { %1868 = shalt.err (!%p1865_p4)
}
  0x59   : > { %s1869_s14 = scalar_lea.vmem %s2287_s17, 128  ;;  %s2083_s10 = smov [#allocation5]  }
  0x5a   : > { %p1870_p5 = scmp.ne.s32.totalorder %s2287_s17, %s1869_s14  ;;  %s1874_s11 = sshll.u32 %s2083_s10, 4  ;;  %s1875_s11 = int_to_ptr.vmem [resolvable:$false] %s1874_s11 }
  0x5b   : > { %s1876_s7 = scalar_lea.vmem %s1875_s11, 256  ;;  %p1877_p2 = scmp.lt.s32.totalorder %s2287_s17, %s1875_s11 }
  0x5c   : > { %p1872_p11 = pnand %p1870_p5, %p2295_p12  ;;  %p1878_p8 = scmp.lt.s32.totalorder %s1876_s7, %s1869_s14 }
  0x5e   : > { %p1873_p13 = pneg %p1872_p11  ;;  %p1879_p3 = por %p1878_p8, %p1877_p2 }
  0x60   : > { %p1880_p7 = pnand %p1879_p3, %p1873_p13 }
  0x62   : > { %1883 = shalt.err (!%p1880_p7)
}
  0x63   : > { %s2762_s25 = smov 4   ;;  %s2763_s20 = smov 64  }
  0x64   : > { %1714 = dma.hbm_to_vmem [thread:$0]  (!%p2275_p6), %s2284_s12, 128, %s2287_s17, %s2289_s18, %s2763_s20, %s2763_s20, %s2762_s25  }
  0x65   : > { %s2084_s24 = smov [#allocation10]   ;;  %s2085_s10 = smov [#allocation11]  }
  0x66   : > { %s396_s2 = sshll.u32 %s2084_s24, 4  ;;  %s409_s28 = sshll.u32 %s2085_s10, 4  ;;  %s397_s2 = int_to_ptr.vmem [resolvable:$true] %s396_s2  ;;  %s410_s28 = int_to_ptr.vmem [resolvable:$true] %s409_s28 }
  0x67   : > { %s1884_s7 = scalar_lea.hbm %s2700_s8, 1024  ;;  %p2764_p8 = scmp.ne.s32.totalorder %s2756_s23, 0 }
  0x68   : > { %p1885_p2 = scmp.ne.s32.totalorder %s2700_s8, %s1884_s7  ;;  %p1891_p10 = scmp.lt.u32.totalorder %s1884_s7, %s2700_s8 }
  0x6a   : > { %p1887_p0 = pnand %p1885_p2, %p2764_p8 }
  0x6c   : > { %p1888_p9 = pneg %p1887_p0 }
  0x6e   : > { %p1893_p1 = pnand %p1891_p10, %p1888_p9 }
  0x70   : > { %1896 = shalt.err (!%p1893_p1)
}
  0x71   : > { %s1897_s12 = scalar_lea.vmem %s397_s2, 1024  ;;  %p1905_p13 = scmp.lt.s32.totalorder %s397_s2, %s397_s2 }
  0x72   : > { %p1898_p4 = scmp.ne.s32.totalorder %s397_s2, %s1897_s12  ;;  %p1906_p3 = scmp.lt.s32.totalorder %s1897_s12, %s1897_s12 }
  0x74   : > { %p1900_p5 = pnand %p1898_p4, %p2764_p8  ;;  %p1907_p7 = por %p1906_p3, %p1905_p13 }
  0x76   : > { %p1901_p11 = pneg %p1900_p5 }
  0x78   : > { %p1908_p6 = pnand %p1907_p7, %p1901_p11 }
  0x7a   : > { %1911 = shalt.err (!%p1908_p6)
}
  0x7b   : > { %p2765_p2 = scmp.ne.s32.totalorder %s2754_s30, 0  ;;  %s1912_s17 = scalar_lea.hbm %s2701_s9, 1024 }
  0x7c   : > { %p1913_p0 = scmp.ne.s32.totalorder %s2701_s9, %s1912_s17  ;;  %p1919_p10 = scmp.lt.u32.totalorder %s1912_s17, %s2701_s9 }
  0x7d   : > { %1704 = dma.hbm_to_vmem [thread:$0]  (!%p2765_p2), %s2700_s8, 1024, %s397_s2, [#allocation9], %s2763_s20, %s2763_s20, %s2762_s25  }
  0x7e   : > { %p1915_p6 = pnand %p1913_p0, %p2764_p8 }
  0x80   : > { %p1916_p9 = pneg %p1915_p6 }
  0x82   : > { %p1921_p1 = pnand %p1919_p10, %p1916_p9 }
  0x84   : > { %1924 = shalt.err (!%p1921_p1)
}
  0x85   : > { %s1925_s7 = scalar_lea.vmem %s410_s28, 1024  ;;  %p1933_p13 = scmp.lt.s32.totalorder %s410_s28, %s410_s28 }
  0x86   : > { %p1926_p4 = scmp.ne.s32.totalorder %s410_s28, %s1925_s7  ;;  %p1934_p3 = scmp.lt.s32.totalorder %s1925_s7, %s1925_s7 }
  0x88   : > { %p1928_p5 = pnand %p1926_p4, %p2764_p8  ;;  %p1935_p7 = por %p1934_p3, %p1933_p13 }
  0x8a   : > { %p1929_p11 = pneg %p1928_p5 }
  0x8c   : > { %p1936_p12 = pnand %p1935_p7, %p1929_p11 }
  0x8e   : > { %1939 = shalt.err (!%p1936_p12)
}
  0x8f   : > { %1707 = dma.hbm_to_vmem [thread:$0]  (!%p2765_p2), %s2701_s9, 1024, %s410_s28, [#allocation12], %s2763_s20, %s2763_s20, %s2762_s25  }
  0x90   : > { %s2368_s4 = scalar_lea.hbm %s2693_s1, %s2269_s21  ;;  %s445_s30 = scalar_lea.vmem [#allocation2], %s2239_s16 }
  0x91   : > { %s452_s5 = sshll.u32 %s445_s30, 4  ;;  %s2377_s24 = scalar_lea.hbm %s2695_s3, %s2269_s21  ;;  %s2371_s5 = int_to_ptr.vmem [resolvable:$true] %s452_s5 }
  0x92   : > { %s2766_s10 = sand.u32 1, %s2074_s27   ;;  %s1940_s11 = scalar_lea.hbm %s2368_s4, 128 }
  0x93   : > { %s2381_s28 = scalar_lea.sflag [#allocation3], %s2766_s10  ;;  %p1941_p12 = scmp.ne.s32.totalorder %s2368_s4, %s1940_s11 }
  0x94   : > { %p2767_p8 = scmp.ne.s32.totalorder %s2761_s13, 0  ;;  %s1945_s2 = scalar_lea.hbm %s2693_s1, 256 }
  0x95   : > { %p1946_p6 = scmp.lt.u32.totalorder %s2368_s4, %s2693_s1  ;;  %p1947_p9 = scmp.lt.u32.totalorder %s1945_s2, %s1940_s11 }
  0x96   : > { %p1943_p2 = pnand %p1941_p12, %p2767_p8  ;;  %p1949_p1 = scmp.lt.u32.totalorder %s1940_s11, %s2368_s4 }
  0x97   : > { %p1948_p10 = por %p1947_p9, %p1946_p6 }
  0x98   : > { %p1944_p0 = pneg %p1943_p2 }
  0x99   : > { %p1950_p4 = por %p1949_p1, %p1948_p10 }
  0x9b   : > { %p1951_p5 = pnand %p1950_p4, %p1944_p0 }
  0x9d   : > { %1954 = shalt.err (!%p1951_p5)
}
  0x9e   : > { %s1955_s21 = scalar_lea.vmem %s2371_s5, 128  ;;  %s2086_s0 = smov [#allocation2]  }
  0x9f   : > { %p1956_p11 = scmp.ne.s32.totalorder %s2371_s5, %s1955_s21  ;;  %s1960_s30 = sshll.u32 %s2086_s0, 4  ;;  %s1961_s30 = int_to_ptr.vmem [resolvable:$false] %s1960_s30 }
  0xa0   : > { %s1962_s6 = scalar_lea.vmem %s1961_s30, 256  ;;  %p1963_p7 = scmp.lt.s32.totalorder %s2371_s5, %s1961_s30 }
  0xa1   : > { %p1958_p13 = pnand %p1956_p11, %p2767_p8  ;;  %p1964_p12 = scmp.lt.s32.totalorder %s1962_s6, %s1955_s21 }
  0xa3   : > { %p1959_p3 = pneg %p1958_p13  ;;  %p1965_p2 = por %p1964_p12, %p1963_p7 }
  0xa5   : > { %p1966_p6 = pnand %p1965_p2, %p1959_p3 }
  0xa7   : > { %1969 = shalt.err (!%p1966_p6)
}
  0xa8   : > { %p2768_p0 = scmp.ne.s32.totalorder %s2759_s15, 0  ;;  %s487_s17 = scalar_lea.vmem [#allocation7], %s2239_s16 }
  0xa9   : > { %s494_s10 = sshll.u32 %s487_s17, 4  ;;  %s1970_s11 = scalar_lea.hbm %s2377_s24, 128  ;;  %s2409_s10 = int_to_ptr.vmem [resolvable:$true] %s494_s10 }
  0xaa   : > { %1711 = dma.hbm_to_vmem [thread:$0]  (!%p2768_p0), %s2368_s4, 128, %s2371_s5, %s2381_s28, %s2763_s20, %s2763_s20, %s2762_s25  }
  0xab   : > { %p1971_p9 = scmp.ne.s32.totalorder %s2377_s24, %s1970_s11  ;;  %s1975_s2 = scalar_lea.hbm %s2695_s3, 256 }
  0xac   : > { %p1976_p4 = scmp.lt.u32.totalorder %s2377_s24, %s2695_s3  ;;  %p1977_p5 = scmp.lt.u32.totalorder %s1975_s2, %s1970_s11 }
  0xad   : > { %p1973_p10 = pnand %p1971_p9, %p2767_p8  ;;  %p1979_p13 = scmp.lt.u32.totalorder %s1970_s11, %s2377_s24 }
  0xae   : > { %p1978_p11 = por %p1977_p5, %p1976_p4 }
  0xaf   : > { %p1974_p1 = pneg %p1973_p10 }
  0xb0   : > { %p1980_p3 = por %p1979_p13, %p1978_p11 }
  0xb2   : > { %p1981_p7 = pnand %p1980_p3, %p1974_p1 }
  0xb4   : > { %1984 = shalt.err (!%p1981_p7)
}
  0xb5   : > { %s1985_s16 = scalar_lea.vmem %s2409_s10, 128  ;;  %s2087_s4 = smov [#allocation7]  }
  0xb6   : > { %p1986_p12 = scmp.ne.s32.totalorder %s2409_s10, %s1985_s16  ;;  %s1990_s5 = sshll.u32 %s2087_s4, 4  ;;  %s1991_s5 = int_to_ptr.vmem [resolvable:$false] %s1990_s5 }
  0xb7   : > { %s1992_s28 = scalar_lea.vmem %s1991_s5, 256  ;;  %p1993_p9 = scmp.lt.s32.totalorder %s2409_s10, %s1991_s5 }
  0xb8   : > { %p1988_p2 = pnand %p1986_p12, %p2767_p8  ;;  %p1994_p10 = scmp.lt.s32.totalorder %s1992_s28, %s1985_s16 }
  0xba   : > { %p1989_p6 = pneg %p1988_p2  ;;  %p1995_p4 = por %p1994_p10, %p1993_p9 }
  0xbc   : > { %p1996_p5 = pnand %p1995_p4, %p1989_p6 }
  0xbe   : > { %1999 = shalt.err (!%p1996_p5)
}
  0xbf   : > { %1717 = dma.hbm_to_vmem [thread:$0]  (!%p2768_p0), %s2377_s24, 128, %s2409_s10, %s2289_s18, %s2763_s20, %s2763_s20, %s2762_s25  }
  0xc0   : > { %p2769_p8 = scmp.ne.s32.totalorder %s2753_s22, 0 }
  0xc1   : > { %s2439_s13 = sand.u32 (!%p2769_p8), 1, %s2070_s26   ;;  %p2770_p1 = scmp.ne.s32.totalorder (!%p2769_p8), %s2748_s19, 0 }
  0xc2   : > { %524 = sbr.rel (%p2769_p8) target bundleno = 903 (0x387), region = 72  ;;  %s2442_s21 = sshll.u32 (!%p2769_p8), %s2439_s13, 3 }
  0xc3   : > { %s527_s15 = scalar_lea.sflag (!%p2769_p8), [#allocation3], %s2439_s13  ;;  %s530_s0 = scalar_lea.vmem (!%p2769_p8), [#allocation2], %s2442_s21 }
  0xc9   : > { %2045 = dma.done.wait (%p2770_p1), %s527_s15, 128  }
  0xca   : > { %2047 = vsyncadd (%p2770_p1), %s527_s15, 4294967168  ;;  %s535_s22 = sand.u32 1, %s2183_s29   ;;  %s539_s25 = scalar_lea.vmem [#allocation5], %s2442_s21 }
  0xcb   : > { %s536_s18 = scalar_lea.sflag [#allocation6], %s535_s22 }
  0xcc   : > { %2049 = dma.done.wait (%p2770_p1), %s536_s18, 256  }
  0xcd   : > { %2051 = vsyncadd (%p2770_p1), %s536_s18, 4294967040  ;;  %s548_s20 = scalar_lea.vmem [#allocation7], %s2442_s21  ;;  %p2771_p0 = scmp.eq.s32.totalorder %s2183_s29, 0 }
  0xcf   : > { %2053 = dma.done.wait (%p2771_p0), [#allocation9], 2048   ;;  %p2772_p11 = pmov %p2771_p0 }
  0xd0   : > { %p2773_p13 = pmov %p2771_p0 }
  0xd1   : > { %2055 = vsyncadd (%p2772_p11), [#allocation9], 4294965248 }
  0xd2   : > { %2057 = dma.done.wait (%p2773_p13), [#allocation12], 1024   ;;  %p2774_p3 = pmov %p2771_p0 }
  0xd3   : > { %v2088_v0 = vmov 0.0   ;;  %vm2089_vm0 = vmmov 0   ;;  %v1772_v1 = vld [vmem:[#allocation11] sm:$0xff]   ;;  %v1774_v3 = vld [vmem:[#allocation11 + $0x8] sm:$0xff]   ;;  %v1776_v5 = vld [vmem:[#allocation11 + $0x10] sm:$0xff]   ;;  %s1510_s19 = sshll.u32 %s2183_s29, 1  ;;  %v653_v62 = vlaneseq }
  0xd4   : > { %2059 = vsyncadd (%p2774_p3), [#allocation12], 4294966272  ;;  %1598 = vmatprep.subr.bf16.mxu0 %v2088_v0  ;;  %1618 = vmatprep.subr.bf16.mxu1 %v2088_v0  ;;  %v1773_v2 = vld [vmem:[#allocation10] sm:$0xff]   ;;  %v1775_v4 = vld [vmem:[#allocation10 + $0x8] sm:$0xff]   ;;  %p629_p7 = scmp.lt.s32.totalorder %s1510_s19, 3  ;;  %s2775_s6 = sld [smem:[#allocation29_spill]] }
  0xd5   : > { %1634 = vmatprep.mubr.msk.bf16.mxu1 %vm2089_vm0, %v2088_v0  ;;  %1614 = vmatprep.mubr.msk.bf16.mxu0 %vm2089_vm0, %v2088_v0  ;;  %v1777_v6 = vld [vmem:[#allocation10 + $0x10] sm:$0xff]   ;;  %v1778_v7 = vld [vmem:[#allocation11 + $0x18] sm:$0xff]   ;;  %v1780_v9 = vld [vmem:[#allocation11 + $0x20] sm:$0xff]   ;;  %s2776_s14 = sld [smem:[#allocation25_spill]]  ;;  %v2090_v37 = vmov 0   ;;  %s2777_s11 = sld [smem:[#allocation27_spill]] }
  0xd6   : > { %1599 = vmatpush3.bf16.msra.mxu0 %v1772_v1  ;;  %1619 = vmatpush3.bf16.msra.mxu1 %v1773_v2  ;;  %v1779_v8 = vld [vmem:[#allocation10 + $0x18] sm:$0xff]   ;;  %v1781_v10 = vld [vmem:[#allocation10 + $0x20] sm:$0xff]   ;;  %v1782_v11 = vld [vmem:[#allocation11 + $0x28] sm:$0xff]   ;;  %s2804_s19 = smov (!%p629_p7, %s1510_s19), 3  ;;  %s2778_s12 = sld [smem:[#allocation28_spill]]  ;;  %v656_v63 = vshrl.u32 %v653_v62, 7 }
  0xd7   : > { %1600 = vmatprep.subr.bf16.mxu0 %v2088_v0  ;;  %1620 = vmatprep.subr.bf16.mxu1 %v2088_v0  ;;  %v1783_v12 = vld [vmem:[#allocation10 + $0x28] sm:$0xff]   ;;  %v1784_v13 = vld [vmem:[#allocation11 + $0x30] sm:$0xff]   ;;  %v1786_v15 = vld [vmem:[#allocation11 + $0x38] sm:$0xff]   ;;  %s1511_s17 = sshll.u32 %s2804_s19, 2  ;;  %v654_v1 = vand.u32 127, %v653_v62  ;;  %s2783_s5 = sld [smem:[#allocation33_spill]] }
  0xd8   : > { %v1785_v14 = vld [vmem:[#allocation10 + $0x30] sm:$0xff]   ;;  %v1787_v16 = vld [vmem:[#allocation10 + $0x38] sm:$0xff]   ;;  %v1788_v17 = vld [vmem:[%s539_s25] sm:$0xff]   ;;  %1771 = vset.pattern.permute.xlu1 %v2090_v37  ;;  %1770 = vset.pattern.permute.xlu0 %v2090_v37  ;;  %v657_v2 = vadd.s32 8, %v656_v63  ;;  %s2784_s25 = sld [smem:[#allocation31_spill]]  ;;  %s2785_s30 = sld [smem:[#allocation32_spill]] }
  0xd9   : > { %v1789_v18 = vld [vmem:[%s548_s20] sm:$0xff]   ;;  %v1791_v20 = vld [vmem:[#allocation8] sm:$0xff]   ;;  %v1793_v22 = vld [vmem:[#allocation8 + $0x8] sm:$0xff]   ;;  %vm663_vm2 = vcmp.lt.s32.totalorder %v654_v1, 32  ;;  %s627_s10 = scalar_lea.vmem [#allocation13], %s2442_s21  ;;  %s2791_s2 = sld [smem:[#allocation34_spill]] }
  0xda   : > { %1601 = vmatpush3.bf16.msra.mxu0 %v1774_v3  ;;  %1621 = vmatpush3.bf16.msra.mxu1 %v1775_v4  ;;  %v1790_v19 = vld [vmem:[%s2775_s6] sm:$0xff]   ;;  %v1792_v21 = vld [vmem:[%s2775_s6 + $0x8] sm:$0xff]   ;;  %v1794_v23 = vld [vmem:[%s2775_s6 + $0x10] sm:$0xff]   ;;  %v658_v3 = vsub.s32 %v654_v1, %v656_v63  ;;  %v659_v4 = vsub.s32 %v654_v1, %v657_v2 }
  0xdb   : > { %1602 = vmatprep.subr.bf16.mxu0 %v2088_v0  ;;  %1622 = vmatprep.subr.bf16.mxu1 %v2088_v0  ;;  %s2501_s7 = scalar_lea.vmem %s2776_s14, %s1511_s17  ;;  %v1795_v24 = vld [vmem:[#allocation8 + $0x10] sm:$0xff]   ;;  %v1796_v25 = vld [vmem:[%s2775_s6 + $0x18] sm:$0xff]   ;;  %v1797_v26 = vld [vmem:[#allocation8 + $0x18] sm:$0xff]   ;;  %s1556_s17 = sshll.u32 %s2183_s29, 7 }
  0xdc   : > { %v1798_v27 = vld [vmem:[%s2775_s6 + $0x20] sm:$0xff]   ;;  %v1799_v28 = vld [vmem:[#allocation8 + $0x20] sm:$0xff]   ;;  %v1800_v29 = vld [vmem:[%s2775_s6 + $0x28] sm:$0xff]  }
  0xdd   : > { %v1801_v30 = vld [vmem:[#allocation8 + $0x28] sm:$0xff]   ;;  %v1802_v31 = vld [vmem:[%s2775_s6 + $0x30] sm:$0xff]   ;;  %v1803_v32 = vld [vmem:[#allocation8 + $0x30] sm:$0xff]  }
  0xde   : > { %1603 = vmatpush3.bf16.msra.mxu0 %v1776_v5  ;;  %1623 = vmatpush3.bf16.msra.mxu1 %v1777_v6  ;;  %v1804_v33 = vld [vmem:[%s2775_s6 + $0x38] sm:$0xff]   ;;  %v1805_v34 = vld [vmem:[#allocation8 + $0x38] sm:$0xff]   ;;  %v1806_v35 = vld [vmem:[%s2501_s7] sm:$0xff]  }
  0xdf   : > { %1604 = vmatprep.subr.bf16.mxu0 %v2088_v0  ;;  %1624 = vmatprep.subr.bf16.mxu1 %v2088_v0  ;;  %v1807_v36 = vld [vmem:[%s530_s0] sm:$0xff]   ;;  %s1513_s0 = sshll.u32 %s2804_s19, 3  ;;  %s1516_s19 = sshll.u32 %s2183_s29, 4 }
  0xe0   : > { %s641_s14 = scalar_lea.vmem %s2777_s11, %s1513_s0  ;;  %s647_s23 = scalar_lea.vmem %s2778_s12, %s1513_s0  ;;  %v660_v5 = vstv %s1516_s19 }
  0xe1   : > { %v780_v57 = vld [vmem:[%s641_s14 + $0x8] sm:$0xff]  ;;  %v937_v58 = vld [vmem:[%s647_s23] sm:$0xff]  ;;  %vm661_vm1 = vcmp.ne.s32.totalorder %v658_v3, %v660_v5  ;;  %vm662_vm3 = vcmp.ne.s32.totalorder %v659_v4, %v660_v5  ;;  %s2790_s0 = sld [smem:[#allocation23_spill]]  ;;  %s1309_s11 = sshll.u32 %s627_s10, 4  ;;  %s2650_s11 = int_to_ptr.vmem [resolvable:$true] %s1309_s11 }
  0xe2   : > { %1605 = vmatpush3.bf16.msra.mxu0 %v1778_v7  ;;  %1625 = vmatpush3.bf16.msra.mxu1 %v1779_v8  ;;  %v779_v59 = vld [vmem:[%s641_s14] sm:$0xff]  ;;  %v938_v61 = vld [vmem:[%s647_s23 + $0x8] sm:$0xff]  ;;  %vm2566_vm4 = vmand %vm661_vm1, %vm663_vm2  ;;  %s2648_s12 = scalar_lea.hbm %s2791_s2, %s1556_s17  ;;  %s1296_s23 = scalar_lea.sflag [#allocation4], %s2439_s13 }
  0xe3   : > { %1606 = vmatprep.subr.bf16.mxu0 %v2088_v0  ;;  %1626 = vmatprep.subr.bf16.mxu1 %v2088_v0  ;;  %vm2570_vm5 = vmand %vm662_vm3, %vm663_vm2  ;;  %v806_v8 = vld [vmem:[%s2783_s5] sm:$0x3]  ;;  %s2000_s19 = scalar_lea.vmem %s2650_s11, 128  ;;  %s2091_s29 = smov [#allocation13]  }
  0xe4   : > { %vm810_vm6 = vmpackc.low %vm2566_vm4, %vm2566_vm4  ;;  %vm808_vm8 = vnez %v806_v8  ;;  %p2001_p12 = scmp.ne.s32.totalorder %s2650_s11, %s2000_s19  ;;  %s2004_s21 = sshll.u32 %s2091_s29, 4  ;;  %s2005_s21 = int_to_ptr.vmem [resolvable:$false] %s2004_s21 }
  0xe5   : > { %vm812_vm7 = vmpackc.low %vm2570_vm5, %vm2570_vm5  ;;  %s2006_s16 = scalar_lea.vmem %s2005_s21, 256  ;;  %p2007_p10 = scmp.lt.s32.totalorder %s2650_s11, %s2005_s21 }
  0xe6   : > { %1607 = vmatpush3.bf16.msra.mxu0 %v1780_v9  ;;  %1627 = vmatpush3.bf16.msra.mxu1 %v1781_v10  ;;  %vm811_vm9 = vmpackc.even %vm810_vm6, %vm810_vm6  ;;  %v807_v10 = vld [vmem:[%s2783_s5 + $0x2] sm:$0x3]  ;;  %p2008_p4 = scmp.lt.s32.totalorder %s2006_s16, %s2000_s19 }
  0xe7   : > { %1608 = vmatprep.subr.bf16.mxu0 %v2088_v0  ;;  %1628 = vmatprep.subr.bf16.mxu1 %v2088_v0  ;;  %vm813_vm10 = vmpackc.even %vm812_vm7, %vm812_vm7  ;;  %vm809_vm12 = vnez %v807_v10  ;;  %p2792_p2 = scmp.ne.s32.totalorder %s2790_s0, 0 }
  0xe8   : > { %vm814_vm11 = vmand %vm808_vm8, %vm811_vm9  ;;  %p2009_p5 = por %p2008_p4, %p2007_p10 }
  0xe9   : > { %vm815_vm14 = vmand %vm809_vm12, %vm813_vm10  ;;  %p2002_p6 = pnand %p2001_p12, %p2792_p2 }
  0xea   : > { %1609 = vmatpush3.bf16.msra.mxu0 %v1782_v11  ;;  %1629 = vmatpush3.bf16.msra.mxu1 %v1783_v12 }
  0xeb   : > { %1610 = vmatprep.subr.bf16.mxu0 %v2088_v0  ;;  %1630 = vmatprep.subr.bf16.mxu1 %v2088_v0  ;;  %p2003_p9 = pneg %p2002_p6 }
  0xed   : > { %p2010_p8 = pnand %p2009_p5, %p2003_p9 }
  0xee   : > { %1611 = vmatpush3.bf16.msra.mxu0 %v1784_v13  ;;  %1631 = vmatpush3.bf16.msra.mxu1 %v1785_v14 }
  0xef   : > { %1612 = vmatprep.subr.bf16.mxu0 %v2088_v0  ;;  %1632 = vmatprep.subr.bf16.mxu1 %v2088_v0 }
  0xf2   : > { %1613 = vmatpush3.bf16.msra.mxu0 %v1786_v15  ;;  %1633 = vmatpush3.bf16.msra.mxu1 %v1787_v16 }
  0xf3   : > { %1638 = vmatprep.subr.bf16.mxu0 %v2088_v0  ;;  %1658 = vmatprep.subr.bf16.mxu1 %v2088_v0 }
  0xf5   : > { %1615 = vmatmul.mubr.bf16.vlgmr.msra.gmra.mrb[0].mxu0 %v1789_v18  ;;  %1635 = vmatmul.mubr.bf16.vlgmr.msra.gmra.mrb[0].mxu1 %v1788_v17  ;;  %v1526_v17 = vld [vmem:[%s2784_s25] ss:$0 sm:$0xff] }
  0xf6   : > { %1639 = vmatpush3.bf16.msra.mxu0 %v1790_v19  ;;  %1659 = vmatpush3.bf16.msra.mxu1 %v1791_v20  ;;  %v816_v20 = vsel %vm814_vm11, 16843009, %v2090_v37 }
  0xf7   : > { %1640 = vmatprep.subr.bf16.mxu0 %v2088_v0  ;;  %1660 = vmatprep.subr.bf16.mxu1 %v2088_v0 }
  0xf8   : > { %1654 = vmatprep.mubr.msk.bf16.mxu0 %vm2089_vm0, %v2088_v0  ;;  %1674 = vmatprep.mubr.msk.bf16.mxu1 %vm2089_vm0, %v2088_v0 }
  0xfa   : > { %1641 = vmatpush3.bf16.msra.mxu0 %v1792_v21  ;;  %1661 = vmatpush3.bf16.msra.mxu1 %v1793_v22  ;;  %v1536_v21 = vld [vmem:[%s2785_s30] ss:$0 sm:$0xff] }
  0xfb   : > { %1642 = vmatprep.subr.bf16.mxu0 %v2088_v0  ;;  %1662 = vmatprep.subr.bf16.mxu1 %v2088_v0 }
  0xfe   : > { %1643 = vmatpush3.bf16.msra.mxu0 %v1794_v23  ;;  %1663 = vmatpush3.bf16.msra.mxu1 %v1795_v24 }
  0xff   : > { %1644 = vmatprep.subr.bf16.mxu0 %v2088_v0  ;;  %1664 = vmatprep.subr.bf16.mxu1 %v2088_v0 }
 0x102   : > { %1645 = vmatpush3.bf16.msra.mxu0 %v1796_v25  ;;  %1665 = vmatpush3.bf16.msra.mxu1 %v1797_v26  ;;  %v818_v25 = vunpack.c.0.s8 %v816_v20  ;;  %v817_v26 = vsel %vm815_vm14, 16843009, %v2090_v37 }
 0x103   : > { %1646 = vmatprep.subr.bf16.mxu0 %v2088_v0  ;;  %1666 = vmatprep.subr.bf16.mxu1 %v2088_v0 }
 0x104   : > { %vm820_vm10 = vcmp.ne.s32.totalorder %v818_v25, 0 }
 0x106   : > { %1647 = vmatpush3.bf16.msra.mxu0 %v1798_v27  ;;  %1667 = vmatpush3.bf16.msra.mxu1 %v1799_v28  ;;  %v819_v28 = vunpack.c.0.s8 %v817_v26 }
 0x107   : > { %1648 = vmatprep.subr.bf16.mxu0 %v2088_v0  ;;  %1668 = vmatprep.subr.bf16.mxu1 %v2088_v0 }
 0x108   : > { %vm821_vm14 = vcmp.ne.s32.totalorder %v819_v28, 0 }
 0x10a   : > { %1649 = vmatpush3.bf16.msra.mxu0 %v1800_v29  ;;  %1669 = vmatpush3.bf16.msra.mxu1 %v1801_v30 }
 0x10b   : > { %1650 = vmatprep.subr.bf16.mxu0 %v2088_v0  ;;  %1670 = vmatprep.subr.bf16.mxu1 %v2088_v0 }
 0x10e   : > { %1651 = vmatpush3.bf16.msra.mxu0 %v1802_v31  ;;  %1671 = vmatpush3.bf16.msra.mxu1 %v1803_v32 }
 0x10f   : > { %1652 = vmatprep.subr.bf16.mxu0 %v2088_v0  ;;  %1672 = vmatprep.subr.bf16.mxu1 %v2088_v0 }
 0x112   : > { %1653 = vmatpush3.bf16.msra.mxu0 %v1804_v33  ;;  %1673 = vmatpush3.bf16.msra.mxu1 %v1805_v34 }
 0x115   : > { %1655 = vmatmul.mubr.bf16.vlgmr.msra.gmra.mrb[4].mxu0 %v1806_v35  ;;  %1675 = vmatmul.mubr.bf16.vlgmr.msra.gmra.mrb[4].mxu1 %v1807_v36 }
 0x1c8   : > { %v2547_v38 = vpop.f32.mrb[0].mxu0  ;;  %v2549_v39 = vpop.f32.mrb[0].mxu1 }
 0x1c9   : > { %v1616_v40 = vpop.f32.mrb[1].mxu0  ;;  %v1636_v41 = vpop.f32.mrb[1].mxu1  ;;  %vm958_vm1 = vcmp.lt.f32.partialorder %v1536_v21, %v2549_v39  ;;  %vm800_vm7 = vcmp.lt.f32.partialorder %v1526_v17, %v2547_v38 }
 0x1ca   : > { %v2551_v42 = vpop.f32.mrb[2].mxu0  ;;  %v2553_v43 = vpop.f32.mrb[2].mxu1 }
 0x1cb   : > { %v1617_v44 = vpop.f32.mrb[3].mxu0  ;;  %v1637_v45 = vpop.f32.mrb[3].mxu1  ;;  %vm801_vm15 = vcmp.lt.f32.partialorder %v1526_v17, %v2551_v42 }
 0x1e8   : > { %v1070_v46 = vpop.f32.mrb[4].mxu0  ;;  %v1207_v48 = vpop.f32.mrb[4].mxu1 }
 0x1e9   : > { %v1077_v47 = vmul.f32 14.285714, %v1070_v46  ;;  %v1656_v49 = vpop.f32.mrb[5].mxu0  ;;  %v1214_v50 = vmul.f32 14.285714, %v1207_v48  ;;  %v1676_v51 = vpop.f32.mrb[5].mxu1 }
 0x1ea   : > { %v1073_v52 = vpop.f32.mrb[6].mxu0  ;;  %v1210_v53 = vpop.f32.mrb[6].mxu1 }
 0x1eb   : > { %1079 = vmax.xlane.f32.xlu0 %v1077_v47  ;;  %v1078_v54 = vmul.f32 14.285714, %v1073_v52  ;;  %v1657_v55 = vpop.f32.mrb[7].mxu0  ;;  %1216 = vmax.xlane.f32.xlu1 %v1214_v50  ;;  %v1677_v56 = vpop.f32.mrb[7].mxu1  ;;  %v2562_v60 = vmul.f32 14.285714, %v1210_v53 }
 0x1ef   : > { %1081 = vmax.xlane.f32.xlu0 %v1078_v54 }
 0x1fc   : > { %788 = vperm.xlu1 %1771, %v780_v57  }
 0x200   : > { %941 = vperm.xlu1 %1771, %v937_v58  }
 0x205   : > { %783 = vperm.xlu0 %1770, %v779_v59  }
 0x224   : > { %1218 = vmax.xlane.f32.xlu1 %v2562_v60 }
 0x235   : > { %946 = vperm.xlu1 %1771, %v938_v61  }
 0x278   : > { %v1080_v9 = vpop.xlane.xlu0 %1079  ;;  %v1217_v11 = vpop.xlane.xlu1 %1216 }
 0x279   : > { %v1083_v12 = vsub.f32 %v1077_v47, %v1080_v9  ;;  %v1220_v13 = vsub.f32 %v1214_v50, %v1217_v11 }
 0x27b   : > { %v1085_v14 = vmul.f32 1.442695, %v1083_v12  ;;  %v1222_v15 = vmul.f32 1.442695, %v1220_v13 }
 0x27c   : > { %v1082_v16 = vpop.xlane.xlu0 %1081  ;;  %v789_v18 = vpop.permute.xlu1 %788 }
 0x27d   : > { %1808 = vpow2.f32 %v1085_v14  ;;  %v1084_v19 = vsub.f32 %v1078_v54, %v1082_v16  ;;  %vm792_vm13 = vcmp.lt.f32.partialorder %v789_v18, %v2551_v42 }
 0x27e   : > { %1810 = vpow2.f32 %v1222_v15  ;;  %vm2595_vm0 = vmor %vm792_vm13, %vm801_vm15 }
 0x27f   : > { %v1087_v22 = vmul.f32 1.442695, %v1084_v19  ;;  %vm805_vm6 = vmand %vm2595_vm0, %vm2570_vm5 }
 0x280   : > { %v942_v24 = vpop.permute.xlu1 %941  ;;  %vm2619_vm15 = vmor %vm805_vm6, %vm821_vm14  ;;  %v1239_v46 = vsel %vm805_vm6, 1.0, %v2088_v0 }
 0x281   : > { %1812 = vpow2.f32 %v1087_v22  ;;  %vm949_vm2 = vcmp.lt.f32.partialorder %v942_v24, %v2549_v39  ;;  %v1252_v39 = vadd.f32 %v1220_v13, %v1083_v12 }
 0x282   : > { %vm960_vm3 = vmor %vm949_vm2, %vm958_vm1 }
 0x283   : > { %vm962_vm8 = vmand %vm960_vm3, %vm2566_vm4 }
 0x284   : > { %v784_v27 = vpop.permute.xlu0 %783  ;;  %v1240_v31 = vsel %vm962_vm8, 0.5, %v2088_v0 }
 0x285   : > { %vm791_vm9 = vcmp.lt.f32.partialorder %v784_v27, %v2547_v38 }
 0x286   : > { %vm802_vm11 = vmor %vm791_vm9, %vm800_vm7 }
 0x287   : > { %v1809_v29 = vpop.eup %1808  ;;  %vm804_vm12 = vmand %vm802_vm11, %vm2566_vm4  ;;  %vm959_vm4 = vcmp.lt.f32.partialorder %v1536_v21, %v2553_v43 }
 0x288   : > { %vm822_vm13 = vmor %vm804_vm12, %vm820_vm10  ;;  %v1238_v30 = vsel %vm804_vm12, 1.0, %v2088_v0  ;;  %v1811_v34 = vpop.eup %1810 }
 0x289   : > { %v1089_v32 = vsel %vm822_vm13, %v1809_v29, 0.0  ;;  %v1242_v33 = vadd.f32 %v1240_v31, %v1238_v30  ;;  %v1226_v38 = vsel %vm822_vm13, %v1811_v34, 0.0 }
 0x28a   : > { %1091 = vadd.xlane.f32.xlu1 %v1089_v32 }
 0x28b   : > { %v1813_v35 = vpop.eup %1812  ;;  %v1254_v40 = vmul.f32 %v1252_v39, %v1242_v33 }
 0x28c   : > { %v1090_v37 = vsel %vm2619_vm15, %v1813_v35, 0.0 }
 0x28d   : > { %1093 = vadd.xlane.f32.xlu0 %v1090_v37 }
 0x28e   : > { %1228 = vadd.xlane.f32.xlu1 %v1226_v38 }
 0x291   : > { %1248 = vadd.xlane.f32.xlu0 %v1242_v33 }
 0x292   : > { %1244 = vadd.xlane.f32.xlu1 %v1238_v30 }
 0x295   : > { %1256 = vadd.xlane.f32.xlu0 %v1254_v40 }
 0x2b1   : > { %v1219_v41 = vpop.xlane.xlu1 %1218 }
 0x2b2   : > { %v1221_v42 = vsub.f32 %v2562_v60, %v1219_v41 }
 0x2b4   : > { %v1224_v44 = vmul.f32 1.442695, %v1221_v42  ;;  %v1253_v48 = vadd.f32 %v1221_v42, %v1084_v19 }
 0x2b5   : > { %v947_v45 = vpop.permute.xlu1 %946 }
 0x2b6   : > { %1814 = vpow2.f32 %v1224_v44  ;;  %vm950_vm1 = vcmp.lt.f32.partialorder %v947_v45, %v2553_v43 }
 0x2b7   : > { %vm961_vm2 = vmor %vm950_vm1, %vm959_vm4 }
 0x2b8   : > { %vm963_vm3 = vmand %vm961_vm2, %vm2570_vm5 }
 0x2b9   : > { %v1241_v47 = vsel %vm963_vm3, 0.5, %v2088_v0 }
 0x2ba   : > { %v1243_v49 = vadd.f32 %v1241_v47, %v1239_v46 }
 0x2bc   : > { %v1255_v50 = vmul.f32 %v1253_v48, %v1243_v49 }
 0x2c0   : > { %v1815_v51 = vpop.eup %1814 }
 0x2c1   : > { %v1227_v43 = vsel %vm2619_vm15, %v1815_v51, 0.0 }
 0x2c2   : > { %1230 = vadd.xlane.f32.xlu1 %v1227_v43 }
 0x2c6   : > { %1246 = vadd.xlane.f32.xlu1 %v1239_v46 }
 0x2ca   : > { %1250 = vadd.xlane.f32.xlu1 %v1243_v49 }
 0x2ce   : > { %1258 = vadd.xlane.f32.xlu1 %v1255_v50 }
 0x317   : > { %v1092_v52 = vpop.xlane.xlu1 %1091 }
 0x318   : > { %v1095_v55 = vmax.f32 %v1092_v52, 1e-37 }
 0x31a   : > { %v1094_v56 = vpop.xlane.xlu0 %1093 }
 0x31b   : > { %v1229_v53 = vpop.xlane.xlu1 %1228  ;;  %v1096_v0 = vmax.f32 %v1094_v56, 1e-37 }
 0x31c   : > { %v1232_v54 = vmax.f32 %v1229_v53, 1e-37 }
 0x31e   : > { %1816 = vlog2.f32 %v1232_v54  ;;  %v1249_v2 = vpop.xlane.xlu0 %1248 }
 0x31f   : > { %1818 = vlog2.f32 %v1095_v55  ;;  %v1245_v57 = vpop.xlane.xlu1 %1244 }
 0x320   : > { %1820 = vlog2.f32 %v1096_v0  ;;  %vm1266_vm5 = vcmp.gt.f32.partialorder %v1245_v57, 0.0 }
 0x321   : > { %v1277_v4 = vsel %vm1266_vm5, %v1249_v2, 0.0 }
 0x322   : > { %v1257_v17 = vpop.xlane.xlu0 %1256 }
 0x328   : > { %v1817_v60 = vpop.eup %1816 }
 0x329   : > { %v1819_v62 = vpop.eup %1818  ;;  %v1235_v63 = vmul.f32 0.6931472, %v1817_v60 }
 0x32a   : > { %v1098_v1 = vmul.f32 0.6931472, %v1819_v62  ;;  %v1821_v8 = vpop.eup %1820 }
 0x32b   : > { %v1100_v11 = vmul.f32 0.6931472, %v1821_v8 }
 0x32c   : > { %v1260_v6 = vadd.f32 %v1235_v63, %v1098_v1 }
 0x32e   : > { %v1262_v12 = vmul.f32 %v1260_v6, %v1249_v2 }
 0x330   : > { %v1264_v18 = vsub.f32 %v1257_v17, %v1262_v12 }
 0x332   : > { %v1268_v24 = vsel %vm1266_vm5, %v1264_v18, 0.0 }
 0x34f   : > { %v1231_v58 = vpop.xlane.xlu1 %1230 }
 0x350   : > { %v1233_v59 = vmax.f32 %v1231_v58, 1e-37 }
 0x352   : > { %1822 = vlog2.f32 %v1233_v59 }
 0x353   : > { %v1247_v61 = vpop.xlane.xlu1 %1246 }
 0x354   : > { %vm1267_vm0 = vcmp.gt.f32.partialorder %v1247_v61, 0.0 }
 0x357   : > { %v1251_v3 = vpop.xlane.xlu1 %1250 }
 0x358   : > { %v1278_v5 = vsel %vm1267_vm0, %v1251_v3, 0.0 }
 0x359   : > { %v1279_v7 = vadd.f32 %v1278_v5, %v1277_v4 }
 0x35b   : > { %v1280_v9 = vrot.slane %v1279_v7, 4  ;;  %v1259_v21 = vpop.xlane.xlu1 %1258 }
 0x35c   : > { %v1823_v10 = vpop.eup %1822 }
 0x35d   : > { %v1237_v13 = vmul.f32 0.6931472, %v1823_v10  ;;  %v1281_v14 = vadd.f32 %v1280_v9, %v1279_v7 }
 0x35f   : > { %v1261_v15 = vadd.f32 %v1237_v13, %v1100_v11  ;;  %v1282_v16 = vrot.slane %v1281_v14, 2 }
 0x361   : > { %v1263_v19 = vmul.f32 %v1261_v15, %v1251_v3  ;;  %v1283_v20 = vadd.f32 %v1282_v16, %v1281_v14 }
 0x363   : > { %v1284_v22 = vrot.slane %v1283_v20, 1  ;;  %v1265_v23 = vsub.f32 %v1259_v21, %v1263_v19 }
 0x365   : > { %v1285_v25 = vadd.f32 %v1284_v22, %v1283_v20  ;;  %v1269_v26 = vsel %vm1267_vm0, %v1265_v23, 0.0 }
 0x366   : > { %v1270_v27 = vadd.f32 %v1269_v26, %v1268_v24 }
 0x367   : > { %vm1286_vm6 = vcmp.gt.f32.partialorder %v1285_v25, 0.0 }
 0x368   : > { %v1287_v28 = vsel %vm1286_vm6, %v1285_v25, 1.0  ;;  %v1271_v29 = vrot.slane %v1270_v27, 4 }
 0x369   : > { %1824 = vrcp.f32 %v1287_v28 }
 0x36a   : > { %v1272_v30 = vadd.f32 %v1271_v29, %v1270_v27 }
 0x36c   : > { %v1273_v31 = vrot.slane %v1272_v30, 2 }
 0x36e   : > { %v1274_v32 = vadd.f32 %v1273_v31, %v1272_v30 }
 0x370   : > { %v1275_v33 = vrot.slane %v1274_v32, 1 }
 0x372   : > { %v1276_v34 = vadd.f32 %v1275_v33, %v1274_v32 }
 0x373   : > { %v1825_v35 = vpop.eup %1824 }
 0x374   : > { %v1289_v36 = vmul.f32 %v1825_v35, %v1276_v34 }
 0x376   : > { %v1290_v37 = vsel %vm1286_vm6, %v1289_v36, 0.0 }
 0x377   : > { %v1292_v38 = vmul.f32 -1.0, %v1290_v37 }
 0x379   : > { %1294 = vst [vmem:[%s627_s10] sm:$0xff] %v1292_v38 }
 0x37a   : > { %2013 = shalt.err (!%p2010_p8)
}
 0x37b   : > { %s2014_s13 = scalar_lea.hbm %s2648_s12, 128  ;;  %s2018_s15 = scalar_lea.hbm %s2791_s2, 256 }
 0x37c   : > { %p2015_p1 = scmp.ne.s32.totalorder %s2648_s12, %s2014_s13  ;;  %p2019_p13 = scmp.lt.u32.totalorder %s2648_s12, %s2791_s2 }
 0x37d   : > { %p2020_p3 = scmp.lt.u32.totalorder %s2018_s15, %s2014_s13  ;;  %p2022_p12 = scmp.lt.u32.totalorder %s2014_s13, %s2648_s12 }
 0x37e   : > { %p2016_p0 = pnand %p2015_p1, %p2792_p2 }
 0x37f   : > { %p2021_p7 = por %p2020_p3, %p2019_p13 }
 0x380   : > { %p2017_p11 = pneg %p2016_p0 }
 0x381   : > { %p2023_p6 = por %p2022_p12, %p2021_p7 }
 0x383   : > { %p2024_p9 = pnand %p2023_p6, %p2017_p11 }
 0x385   : > { %2027 = shalt.err (!%p2024_p9)
}
 0x386   : > { %1696 = dma.vmem_to_hbm [thread:$0]  (%p2792_p2), %s2650_s11, 128, %s2648_s12, %s1296_s23  }
 0x387 PF: > { %s2793_s25 = sld [smem:[#allocation19_spill]]  ;;  %s2794_s20 = sld [smem:[#allocation24_spill]] }
 0x388   : > { %s2795_s24 = sld [smem:[#allocation20_spill]] }
 0x38d   : > { %s1321_s30 = sand.u32 1, %s2793_s25   ;;  %p2796_p10 = scmp.ne.s32.totalorder %s2794_s20, 0 }
 0x38e   : > { %p2797_p4 = scmp.ge.s32.totalorder %s2795_s24, 2  ;;  %s1322_s17 = scalar_lea.sflag [#allocation4], %s1321_s30 }
 0x390   : > { %p1719_p5 = pnand %p2797_p4, %p2796_p10 }
 0x392   : > { %2061 = dma.done.wait (!%p1719_p5), %s1322_s17, 128  }
 0x393   : > { %2063 = vsyncadd (!%p1719_p5), %s1322_s17, 4294967168  ;;  %s2798_s28 = sld [smem:[#allocation21_spill]]  ;;  %s2799_s10 = sld [smem:[#allocation22_spill]] }
 0x394   : > { %s2800_s25 = smov %s2070_s26  ;;  %s2801_s26 = smov %s2074_s27 }
 0x399   : > { %p31_p8 = scmp.ge.s32.totalorder %s2798_s28, 4   ;;  %s2802_s27 = smov %s2799_s10 }
 0x39b   :  { %33 = sbr.rel (!%p31_p8) target bundleno = 20 (0x14), region = 162 }
 0x3a2   :  { %1327 = vsyncpa [#allocation3], 1 }
 0x3a3   :  { %1329 = vsyncpa [#allocation3 + $0x1], 1 }
 0x3a4   :  { %1330 = vsyncpa [#allocation6], 1 }
 0x3a5   :  { %1332 = vsyncpa [#allocation6 + $0x1], 1 }
 0x3a6   :  { %1333 = vsyncpa [#allocation9], 1 }
 0x3a7   :  { %1334 = vsyncpa [#allocation12], 1 }
 0x3a8   :  { %1335 = vsyncpa [#allocation4], 1 }
 0x3a9   :  { %1337 = vsyncpa [#allocation4 + $0x1], 1 }

</bundles_post_ra>
